<compile_context>
chip_gen: v7x
topology: tpu7x:2x2x1
jax: 0.10.0
libtpu: 0.0.40
codegen_flags: <defaults>
</compile_context>

<pallas_src>
import jax
import jax.numpy as jnp
from jax.experimental import pallas as pl
from jax.experimental.pallas import tpu as pltpu


_LANE = 512            # lane (last-dim) width of the sample tiles; multiple of 128
_SUBLANE = 8
_MAX_BLOCK_ROWS = 256  # 256 x 512 f32 = 512 KiB per block (x2 in/out, x2 dbl-buffer)


def _round_up(n: int, m: int) -> int:
    return ((n + m - 1) // m) * m


def _plan(n: int):
    """Pick (block_rows, rows_total) for n samples laid out as (rows_total, _LANE)."""
    rows = -(-max(n, 1) // _LANE)          # ceil-div
    rows = _round_up(rows, _SUBLANE)
    if rows <= _MAX_BLOCK_ROWS:
        return rows, rows                  # single block holds everything
    block_rows = _MAX_BLOCK_ROWS
    # Prefer >= ~8 grid steps (v7x 2-TC load balance) while keeping >= 32K samples/step.
    while block_rows > 64 and rows // block_rows < 8:
        block_rows //= 2
    rows_total = _round_up(rows, block_rows)
    return block_rows, rows_total


def mlp_kernel(p_ref, x_ref, o_ref):
    # p_ref: (4, H) f32 in SMEM; rows = [w1, b1, w2, b2 (broadcast)].
    # x_ref / o_ref: (block_rows, _LANE) f32 tiles in VMEM.
    x = x_ref[...]
    n_hidden = p_ref.shape[1]
    acc = jnp.zeros_like(x)
    # Unrolled per-hidden-unit accumulation (H is small, <= ~100). Scalars splat from
    # SMEM; no (H, tile) intermediate and no XLU reduce.
    # TODO(synk): optionally offload the w2-weighted reduce to the idle MXU if bf16
    # precision is ever acceptable; kept on the VPU here for the 1e-5 tolerance.
    for h in range(n_hidden):
        w1h = p_ref[0, h]
        b1h = p_ref[1, h]
        w2h = p_ref[2, h]
        acc = acc + w2h * jnp.maximum(x * w1h + b1h, 0.0)
    o_ref[...] = (acc + p_ref[3, 0]).astype(o_ref.dtype)


@jax.jit
def modelo_ventas_forward(x, w1, b1, w2, b2):
    """Forward of ModeloVentas.

    x:  (N, 1) f32 samples
    w1: (H, 1) f32  (PyTorch capa_oculta.weight)
    b1: (H,)   f32  (PyTorch capa_oculta.bias)
    w2: (1, H) f32  (PyTorch capa_salida.weight)
    b2: (1,)   f32  (PyTorch capa_salida.bias)
    returns (N, 1) f32
    """
    N = x.shape[0]
    H = w1.shape[0]
    if N == 0:
        return jnp.zeros((0, 1), jnp.float32)

    # Pack the (tiny) parameters into a single (4, H) SMEM-bound array.
    b2_scalar = jnp.reshape(b2, ()).astype(jnp.float32)
    params = jnp.stack(
        [
            w1.reshape(H).astype(jnp.float32),
            b1.reshape(H).astype(jnp.float32),
            w2.reshape(H).astype(jnp.float32),
            jnp.full((H,), b2_scalar),
        ],
        axis=0,
    )  # (4, H)

    # Sublane-dense 2-D layout: pad N up to rows_total * _LANE and reshape.
    block_rows, rows_total = _plan(N)
    n_pad = rows_total * _LANE
    x_flat = x.reshape(N).astype(jnp.float32)
    x_2d = jnp.pad(x_flat, (0, n_pad - N)).reshape(rows_total, _LANE)

    grid = (rows_total // block_rows,)
    out = pl.pallas_call(
        mlp_kernel,
        out_shape=jax.ShapeDtypeStruct((rows_total, _LANE), jnp.float32),
        grid=grid,
        in_specs=[
            # Whole parameter array, resident in SMEM; read as scalar splats.
            pl.BlockSpec(memory_space=pltpu.MemorySpace.SMEM),
            # Samples: tiled along the (sublane-dense) row axis.
            pl.BlockSpec((block_rows, _LANE), lambda i: (i, 0)),
        ],
        out_specs=pl.BlockSpec((block_rows, _LANE), lambda i: (i, 0)),
        compiler_params=pltpu.CompilerParams(
            dimension_semantics=("parallel",),   # shard batch axis on v7x's 2 TCs
            vmem_limit_bytes=32 * 1024 * 1024,   # explicit; tiles use only a few MiB
        ),
    )(params, x_2d)

    return out.reshape(n_pad)[:N].reshape(N, 1)


def _reference(x, w1, b1, w2, b2):
    # Plain-JAX mirror of the PyTorch forward (nn.Linear: y = x @ W.T + b).
    h = jnp.maximum(x @ w1.T + b1[None, :], 0.0)
    return h @ w2.T + b2[None, :]


if __name__ == "__main__":
    key = jax.random.PRNGKey(0)
    k_x, k_w1, k_b1, k_w2, k_b2, k_x2, k_x3 = jax.random.split(key, 7)

    H = 32  # neuronas_ocultas

    # PyTorch-native parameter shapes.
    w1 = jax.random.normal(k_w1, (H, 1), dtype=jnp.float32) * 0.5
    b1 = jax.random.normal(k_b1, (H,), dtype=jnp.float32) * 0.1
    w2 = jax.random.normal(k_w2, (1, H), dtype=jnp.float32) * 0.5
    b2 = jax.random.normal(k_b2, (1,), dtype=jnp.float32) * 0.1

    # Small batch (e.g. months): single-tile path.
    N_small = 8
    x_small = jax.random.normal(k_x, (N_small, 1), dtype=jnp.float32)
    out_small = jax.block_until_ready(modelo_ventas_forward(x_small, w1, b1, w2, b2))
    ref_small = _reference(x_small, w1, b1, w2, b2)
    assert out_small.shape == (N_small, 1)
    assert jnp.allclose(out_small, ref_small, atol=1e-5, rtol=1e-5)

    # Medium batch: exercises lane/row padding within a single block.
    N_mid = 1027
    x_mid = jax.random.normal(k_x2, (N_mid, 1), dtype=jnp.float32)
    out_mid = jax.block_until_ready(modelo_ventas_forward(x_mid, w1, b1, w2, b2))
    ref_mid = _reference(x_mid, w1, b1, w2, b2)
    assert out_mid.shape == (N_mid, 1)
    assert jnp.allclose(out_mid, ref_mid, atol=1e-5, rtol=1e-5)

    # Larger batch: exercises the multi-block grid (>= 2 steps, parallel axis).
    N_large = 140_000
    x_large = jax.random.normal(k_x3, (N_large, 1), dtype=jnp.float32)
    out_large = jax.block_until_ready(modelo_ventas_forward(x_large, w1, b1, w2, b2))
    ref_large = _reference(x_large, w1, b1, w2, b2)
    assert out_large.shape == (N_large, 1)
    assert jnp.allclose(out_large, ref_large, atol=1e-5, rtol=1e-5)

    print("KERNEL_OK")
</pallas_src>

<mosaic_0001>
module attributes {stable_mosaic.version = 11 : i64} {
  func.func @mlp_kernel(%arg0: i32, %arg1: memref<4x32xf32, #tpu.memory_space<smem>>, %arg2: memref<8x512xf32, #tpu.memory_space<vmem>>, %arg3: memref<8x512xf32, #tpu.memory_space<vmem>>) attributes {dimension_semantics = [#tpu.dimension_semantics<parallel>], iteration_bounds = array<i64: 1>, scalar_prefetch = 0 : i64, scratch_operands = 0 : i64, tpu.core_type = #tpu.core_type<tc>, window_params = [{transform_indices = @transform_0, window_bounds = array<i64: 4, 32>}, {transform_indices = @transform_1, window_bounds = array<i64: 8, 512>}, {transform_indices = @transform_2, window_bounds = array<i64: 8, 512>}]} {
    %c0 = arith.constant 0 : index
    %c0_0 = arith.constant 0 : index
    %0 = vector.load %arg2[%c0, %c0_0] : memref<8x512xf32, #tpu.memory_space<vmem>>, vector<8x512xf32>
    %cst = arith.constant 0.000000e+00 : f32
    %1 = vector.broadcast %cst : f32 to vector<8x512xf32>
    %c0_1 = arith.constant 0 : index
    %c0_2 = arith.constant 0 : index
    %2 = memref.load %arg1[%c0_1, %c0_2] : memref<4x32xf32, #tpu.memory_space<smem>>
    %c1 = arith.constant 1 : index
    %c0_3 = arith.constant 0 : index
    %3 = memref.load %arg1[%c1, %c0_3] : memref<4x32xf32, #tpu.memory_space<smem>>
    %c2 = arith.constant 2 : index
    %c0_4 = arith.constant 0 : index
    %4 = memref.load %arg1[%c2, %c0_4] : memref<4x32xf32, #tpu.memory_space<smem>>
    %5 = vector.broadcast %2 : f32 to vector<8x512xf32>
    %6 = arith.mulf %0, %5 : vector<8x512xf32>
    %7 = vector.broadcast %3 : f32 to vector<8x512xf32>
    %8 = arith.addf %6, %7 : vector<8x512xf32>
    %cst_5 = arith.constant 0.000000e+00 : f32
    %9 = vector.broadcast %cst_5 : f32 to vector<8x512xf32>
    %10 = arith.maximumf %8, %9 : vector<8x512xf32>
    %11 = vector.broadcast %4 : f32 to vector<8x512xf32>
    %12 = arith.mulf %11, %10 : vector<8x512xf32>
    %13 = arith.addf %1, %12 : vector<8x512xf32>
    %c0_6 = arith.constant 0 : index
    %c1_7 = arith.constant 1 : index
    %14 = memref.load %arg1[%c0_6, %c1_7] : memref<4x32xf32, #tpu.memory_space<smem>>
    %c1_8 = arith.constant 1 : index
    %c1_9 = arith.constant 1 : index
    %15 = memref.load %arg1[%c1_8, %c1_9] : memref<4x32xf32, #tpu.memory_space<smem>>
    %c2_10 = arith.constant 2 : index
    %c1_11 = arith.constant 1 : index
    %16 = memref.load %arg1[%c2_10, %c1_11] : memref<4x32xf32, #tpu.memory_space<smem>>
    %17 = vector.broadcast %14 : f32 to vector<8x512xf32>
    %18 = arith.mulf %0, %17 : vector<8x512xf32>
    %19 = vector.broadcast %15 : f32 to vector<8x512xf32>
    %20 = arith.addf %18, %19 : vector<8x512xf32>
    %cst_12 = arith.constant 0.000000e+00 : f32
    %21 = vector.broadcast %cst_12 : f32 to vector<8x512xf32>
    %22 = arith.maximumf %20, %21 : vector<8x512xf32>
    %23 = vector.broadcast %16 : f32 to vector<8x512xf32>
    %24 = arith.mulf %23, %22 : vector<8x512xf32>
    %25 = arith.addf %13, %24 : vector<8x512xf32>
    %c0_13 = arith.constant 0 : index
    %c2_14 = arith.constant 2 : index
    %26 = memref.load %arg1[%c0_13, %c2_14] : memref<4x32xf32, #tpu.memory_space<smem>>
    %c1_15 = arith.constant 1 : index
    %c2_16 = arith.constant 2 : index
    %27 = memref.load %arg1[%c1_15, %c2_16] : memref<4x32xf32, #tpu.memory_space<smem>>
    %c2_17 = arith.constant 2 : index
    %c2_18 = arith.constant 2 : index
    %28 = memref.load %arg1[%c2_17, %c2_18] : memref<4x32xf32, #tpu.memory_space<smem>>
    %29 = vector.broadcast %26 : f32 to vector<8x512xf32>
    %30 = arith.mulf %0, %29 : vector<8x512xf32>
    %31 = vector.broadcast %27 : f32 to vector<8x512xf32>
    %32 = arith.addf %30, %31 : vector<8x512xf32>
    %cst_19 = arith.constant 0.000000e+00 : f32
    %33 = vector.broadcast %cst_19 : f32 to vector<8x512xf32>
    %34 = arith.maximumf %32, %33 : vector<8x512xf32>
    %35 = vector.broadcast %28 : f32 to vector<8x512xf32>
    %36 = arith.mulf %35, %34 : vector<8x512xf32>
    %37 = arith.addf %25, %36 : vector<8x512xf32>
    %c0_20 = arith.constant 0 : index
    %c3 = arith.constant 3 : index
    %38 = memref.load %arg1[%c0_20, %c3] : memref<4x32xf32, #tpu.memory_space<smem>>
    %c1_21 = arith.constant 1 : index
    %c3_22 = arith.constant 3 : index
    %39 = memref.load %arg1[%c1_21, %c3_22] : memref<4x32xf32, #tpu.memory_space<smem>>
    %c2_23 = arith.constant 2 : index
    %c3_24 = arith.constant 3 : index
    %40 = memref.load %arg1[%c2_23, %c3_24] : memref<4x32xf32, #tpu.memory_space<smem>>
    %41 = vector.broadcast %38 : f32 to vector<8x512xf32>
    %42 = arith.mulf %0, %41 : vector<8x512xf32>
    %43 = vector.broadcast %39 : f32 to vector<8x512xf32>
    %44 = arith.addf %42, %43 : vector<8x512xf32>
    %cst_25 = arith.constant 0.000000e+00 : f32
    %45 = vector.broadcast %cst_25 : f32 to vector<8x512xf32>
    %46 = arith.maximumf %44, %45 : vector<8x512xf32>
    %47 = vector.broadcast %40 : f32 to vector<8x512xf32>
    %48 = arith.mulf %47, %46 : vector<8x512xf32>
    %49 = arith.addf %37, %48 : vector<8x512xf32>
    %c0_26 = arith.constant 0 : index
    %c4 = arith.constant 4 : index
    %50 = memref.load %arg1[%c0_26, %c4] : memref<4x32xf32, #tpu.memory_space<smem>>
    %c1_27 = arith.constant 1 : index
    %c4_28 = arith.constant 4 : index
    %51 = memref.load %arg1[%c1_27, %c4_28] : memref<4x32xf32, #tpu.memory_space<smem>>
    %c2_29 = arith.constant 2 : index
    %c4_30 = arith.constant 4 : index
    %52 = memref.load %arg1[%c2_29, %c4_30] : memref<4x32xf32, #tpu.memory_space<smem>>
    %53 = vector.broadcast %50 : f32 to vector<8x512xf32>
    %54 = arith.mulf %0, %53 : vector<8x512xf32>
    %55 = vector.broadcast %51 : f32 to vector<8x512xf32>
    %56 = arith.addf %54, %55 : vector<8x512xf32>
    %cst_31 = arith.constant 0.000000e+00 : f32
    %57 = vector.broadcast %cst_31 : f32 to vector<8x512xf32>
    %58 = arith.maximumf %56, %57 : vector<8x512xf32>
    %59 = vector.broadcast %52 : f32 to vector<8x512xf32>
    %60 = arith.mulf %59, %58 : vector<8x512xf32>
    %61 = arith.addf %49, %60 : vector<8x512xf32>
    %c0_32 = arith.constant 0 : index
    %c5 = arith.constant 5 : index
    %62 = memref.load %arg1[%c0_32, %c5] : memref<4x32xf32, #tpu.memory_space<smem>>
    %c1_33 = arith.constant 1 : index
    %c5_34 = arith.constant 5 : index
    %63 = memref.load %arg1[%c1_33, %c5_34] : memref<4x32xf32, #tpu.memory_space<smem>>
    %c2_35 = arith.constant 2 : index
    %c5_36 = arith.constant 5 : index
    %64 = memref.load %arg1[%c2_35, %c5_36] : memref<4x32xf32, #tpu.memory_space<smem>>
    %65 = vector.broadcast %62 : f32 to vector<8x512xf32>
    %66 = arith.mulf %0, %65 : vector<8x512xf32>
    %67 = vector.broadcast %63 : f32 to vector<8x512xf32>
    %68 = arith.addf %66, %67 : vector<8x512xf32>
    %cst_37 = arith.constant 0.000000e+00 : f32
    %69 = vector.broadcast %cst_37 : f32 to vector<8x512xf32>
    %70 = arith.maximumf %68, %69 : vector<8x512xf32>
    %71 = vector.broadcast %64 : f32 to vector<8x512xf32>
    %72 = arith.mulf %71, %70 : vector<8x512xf32>
    %73 = arith.addf %61, %72 : vector<8x512xf32>
    %c0_38 = arith.constant 0 : index
    %c6 = arith.constant 6 : index
    %74 = memref.load %arg1[%c0_38, %c6] : memref<4x32xf32, #tpu.memory_space<smem>>
    %c1_39 = arith.constant 1 : index
    %c6_40 = arith.constant 6 : index
    %75 = memref.load %arg1[%c1_39, %c6_40] : memref<4x32xf32, #tpu.memory_space<smem>>
    %c2_41 = arith.constant 2 : index
    %c6_42 = arith.constant 6 : index
    %76 = memref.load %arg1[%c2_41, %c6_42] : memref<4x32xf32, #tpu.memory_space<smem>>
    %77 = vector.broadcast %74 : f32 to vector<8x512xf32>
    %78 = arith.mulf %0, %77 : vector<8x512xf32>
    %79 = vector.broadcast %75 : f32 to vector<8x512xf32>
    %80 = arith.addf %78, %79 : vector<8x512xf32>
    %cst_43 = arith.constant 0.000000e+00 : f32
    %81 = vector.broadcast %cst_43 : f32 to vector<8x512xf32>
    %82 = arith.maximumf %80, %81 : vector<8x512xf32>
    %83 = vector.broadcast %76 : f32 to vector<8x512xf32>
    %84 = arith.mulf %83, %82 : vector<8x512xf32>
    %85 = arith.addf %73, %84 : vector<8x512xf32>
    %c0_44 = arith.constant 0 : index
    %c7 = arith.constant 7 : index
    %86 = memref.load %arg1[%c0_44, %c7] : memref<4x32xf32, #tpu.memory_space<smem>>
    %c1_45 = arith.constant 1 : index
    %c7_46 = arith.constant 7 : index
    %87 = memref.load %arg1[%c1_45, %c7_46] : memref<4x32xf32, #tpu.memory_space<smem>>
    %c2_47 = arith.constant 2 : index
    %c7_48 = arith.constant 7 : index
    %88 = memref.load %arg1[%c2_47, %c7_48] : memref<4x32xf32, #tpu.memory_space<smem>>
    %89 = vector.broadcast %86 : f32 to vector<8x512xf32>
    %90 = arith.mulf %0, %89 : vector<8x512xf32>
    %91 = vector.broadcast %87 : f32 to vector<8x512xf32>
    %92 = arith.addf %90, %91 : vector<8x512xf32>
    %cst_49 = arith.constant 0.000000e+00 : f32
    %93 = vector.broadcast %cst_49 : f32 to vector<8x512xf32>
    %94 = arith.maximumf %92, %93 : vector<8x512xf32>
    %95 = vector.broadcast %88 : f32 to vector<8x512xf32>
    %96 = arith.mulf %95, %94 : vector<8x512xf32>
    %97 = arith.addf %85, %96 : vector<8x512xf32>
    %c0_50 = arith.constant 0 : index
    %c8 = arith.constant 8 : index
    %98 = memref.load %arg1[%c0_50, %c8] : memref<4x32xf32, #tpu.memory_space<smem>>
    %c1_51 = arith.constant 1 : index
    %c8_52 = arith.constant 8 : index
    %99 = memref.load %arg1[%c1_51, %c8_52] : memref<4x32xf32, #tpu.memory_space<smem>>
    %c2_53 = arith.constant 2 : index
    %c8_54 = arith.constant 8 : index
    %100 = memref.load %arg1[%c2_53, %c8_54] : memref<4x32xf32, #tpu.memory_space<smem>>
    %101 = vector.broadcast %98 : f32 to vector<8x512xf32>
    %102 = arith.mulf %0, %101 : vector<8x512xf32>
    %103 = vector.broadcast %99 : f32 to vector<8x512xf32>
    %104 = arith.addf %102, %103 : vector<8x512xf32>
    %cst_55 = arith.constant 0.000000e+00 : f32
    %105 = vector.broadcast %cst_55 : f32 to vector<8x512xf32>
    %106 = arith.maximumf %104, %105 : vector<8x512xf32>
    %107 = vector.broadcast %100 : f32 to vector<8x512xf32>
    %108 = arith.mulf %107, %106 : vector<8x512xf32>
    %109 = arith.addf %97, %108 : vector<8x512xf32>
    %c0_56 = arith.constant 0 : index
    %c9 = arith.constant 9 : index
    %110 = memref.load %arg1[%c0_56, %c9] : memref<4x32xf32, #tpu.memory_space<smem>>
    %c1_57 = arith.constant 1 : index
    %c9_58 = arith.constant 9 : index
    %111 = memref.load %arg1[%c1_57, %c9_58] : memref<4x32xf32, #tpu.memory_space<smem>>
    %c2_59 = arith.constant 2 : index
    %c9_60 = arith.constant 9 : index
    %112 = memref.load %arg1[%c2_59, %c9_60] : memref<4x32xf32, #tpu.memory_space<smem>>
    %113 = vector.broadcast %110 : f32 to vector<8x512xf32>
    %114 = arith.mulf %0, %113 : vector<8x512xf32>
    %115 = vector.broadcast %111 : f32 to vector<8x512xf32>
    %116 = arith.addf %114, %115 : vector<8x512xf32>
    %cst_61 = arith.constant 0.000000e+00 : f32
    %117 = vector.broadcast %cst_61 : f32 to vector<8x512xf32>
    %118 = arith.maximumf %116, %117 : vector<8x512xf32>
    %119 = vector.broadcast %112 : f32 to vector<8x512xf32>
    %120 = arith.mulf %119, %118 : vector<8x512xf32>
    %121 = arith.addf %109, %120 : vector<8x512xf32>
    %c0_62 = arith.constant 0 : index
    %c10 = arith.constant 10 : index
    %122 = memref.load %arg1[%c0_62, %c10] : memref<4x32xf32, #tpu.memory_space<smem>>
    %c1_63 = arith.constant 1 : index
    %c10_64 = arith.constant 10 : index
    %123 = memref.load %arg1[%c1_63, %c10_64] : memref<4x32xf32, #tpu.memory_space<smem>>
    %c2_65 = arith.constant 2 : index
    %c10_66 = arith.constant 10 : index
    %124 = memref.load %arg1[%c2_65, %c10_66] : memref<4x32xf32, #tpu.memory_space<smem>>
    %125 = vector.broadcast %122 : f32 to vector<8x512xf32>
    %126 = arith.mulf %0, %125 : vector<8x512xf32>
    %127 = vector.broadcast %123 : f32 to vector<8x512xf32>
    %128 = arith.addf %126, %127 : vector<8x512xf32>
    %cst_67 = arith.constant 0.000000e+00 : f32
    %129 = vector.broadcast %cst_67 : f32 to vector<8x512xf32>
    %130 = arith.maximumf %128, %129 : vector<8x512xf32>
    %131 = vector.broadcast %124 : f32 to vector<8x512xf32>
    %132 = arith.mulf %131, %130 : vector<8x512xf32>
    %133 = arith.addf %121, %132 : vector<8x512xf32>
    %c0_68 = arith.constant 0 : index
    %c11 = arith.constant 11 : index
    %134 = memref.load %arg1[%c0_68, %c11] : memref<4x32xf32, #tpu.memory_space<smem>>
    %c1_69 = arith.constant 1 : index
    %c11_70 = arith.constant 11 : index
    %135 = memref.load %arg1[%c1_69, %c11_70] : memref<4x32xf32, #tpu.memory_space<smem>>
    %c2_71 = arith.constant 2 : index
    %c11_72 = arith.constant 11 : index
    %136 = memref.load %arg1[%c2_71, %c11_72] : memref<4x32xf32, #tpu.memory_space<smem>>
    %137 = vector.broadcast %134 : f32 to vector<8x512xf32>
    %138 = arith.mulf %0, %137 : vector<8x512xf32>
    %139 = vector.broadcast %135 : f32 to vector<8x512xf32>
    %140 = arith.addf %138, %139 : vector<8x512xf32>
    %cst_73 = arith.constant 0.000000e+00 : f32
    %141 = vector.broadcast %cst_73 : f32 to vector<8x512xf32>
    %142 = arith.maximumf %140, %141 : vector<8x512xf32>
    %143 = vector.broadcast %136 : f32 to vector<8x512xf32>
    %144 = arith.mulf %143, %142 : vector<8x512xf32>
    %145 = arith.addf %133, %144 : vector<8x512xf32>
    %c0_74 = arith.constant 0 : index
    %c12 = arith.constant 12 : index
    %146 = memref.load %arg1[%c0_74, %c12] : memref<4x32xf32, #tpu.memory_space<smem>>
    %c1_75 = arith.constant 1 : index
    %c12_76 = arith.constant 12 : index
    %147 = memref.load %arg1[%c1_75, %c12_76] : memref<4x32xf32, #tpu.memory_space<smem>>
    %c2_77 = arith.constant 2 : index
    %c12_78 = arith.constant 12 : index
    %148 = memref.load %arg1[%c2_77, %c12_78] : memref<4x32xf32, #tpu.memory_space<smem>>
    %149 = vector.broadcast %146 : f32 to vector<8x512xf32>
    %150 = arith.mulf %0, %149 : vector<8x512xf32>
    %151 = vector.broadcast %147 : f32 to vector<8x512xf32>
    %152 = arith.addf %150, %151 : vector<8x512xf32>
    %cst_79 = arith.constant 0.000000e+00 : f32
    %153 = vector.broadcast %cst_79 : f32 to vector<8x512xf32>
    %154 = arith.maximumf %152, %153 : vector<8x512xf32>
    %155 = vector.broadcast %148 : f32 to vector<8x512xf32>
    %156 = arith.mulf %155, %154 : vector<8x512xf32>
    %157 = arith.addf %145, %156 : vector<8x512xf32>
    %c0_80 = arith.constant 0 : index
    %c13 = arith.constant 13 : index
    %158 = memref.load %arg1[%c0_80, %c13] : memref<4x32xf32, #tpu.memory_space<smem>>
    %c1_81 = arith.constant 1 : index
    %c13_82 = arith.constant 13 : index
    %159 = memref.load %arg1[%c1_81, %c13_82] : memref<4x32xf32, #tpu.memory_space<smem>>
    %c2_83 = arith.constant 2 : index
    %c13_84 = arith.constant 13 : index
    %160 = memref.load %arg1[%c2_83, %c13_84] : memref<4x32xf32, #tpu.memory_space<smem>>
    %161 = vector.broadcast %158 : f32 to vector<8x512xf32>
    %162 = arith.mulf %0, %161 : vector<8x512xf32>
    %163 = vector.broadcast %159 : f32 to vector<8x512xf32>
    %164 = arith.addf %162, %163 : vector<8x512xf32>
    %cst_85 = arith.constant 0.000000e+00 : f32
    %165 = vector.broadcast %cst_85 : f32 to vector<8x512xf32>
    %166 = arith.maximumf %164, %165 : vector<8x512xf32>
    %167 = vector.broadcast %160 : f32 to vector<8x512xf32>
    %168 = arith.mulf %167, %166 : vector<8x512xf32>
    %169 = arith.addf %157, %168 : vector<8x512xf32>
    %c0_86 = arith.constant 0 : index
    %c14 = arith.constant 14 : index
    %170 = memref.load %arg1[%c0_86, %c14] : memref<4x32xf32, #tpu.memory_space<smem>>
    %c1_87 = arith.constant 1 : index
    %c14_88 = arith.constant 14 : index
    %171 = memref.load %arg1[%c1_87, %c14_88] : memref<4x32xf32, #tpu.memory_space<smem>>
    %c2_89 = arith.constant 2 : index
    %c14_90 = arith.constant 14 : index
    %172 = memref.load %arg1[%c2_89, %c14_90] : memref<4x32xf32, #tpu.memory_space<smem>>
    %173 = vector.broadcast %170 : f32 to vector<8x512xf32>
    %174 = arith.mulf %0, %173 : vector<8x512xf32>
    %175 = vector.broadcast %171 : f32 to vector<8x512xf32>
    %176 = arith.addf %174, %175 : vector<8x512xf32>
    %cst_91 = arith.constant 0.000000e+00 : f32
    %177 = vector.broadcast %cst_91 : f32 to vector<8x512xf32>
    %178 = arith.maximumf %176, %177 : vector<8x512xf32>
    %179 = vector.broadcast %172 : f32 to vector<8x512xf32>
    %180 = arith.mulf %179, %178 : vector<8x512xf32>
    %181 = arith.addf %169, %180 : vector<8x512xf32>
    %c0_92 = arith.constant 0 : index
    %c15 = arith.constant 15 : index
    %182 = memref.load %arg1[%c0_92, %c15] : memref<4x32xf32, #tpu.memory_space<smem>>
    %c1_93 = arith.constant 1 : index
    %c15_94 = arith.constant 15 : index
    %183 = memref.load %arg1[%c1_93, %c15_94] : memref<4x32xf32, #tpu.memory_space<smem>>
    %c2_95 = arith.constant 2 : index
    %c15_96 = arith.constant 15 : index
    %184 = memref.load %arg1[%c2_95, %c15_96] : memref<4x32xf32, #tpu.memory_space<smem>>
    %185 = vector.broadcast %182 : f32 to vector<8x512xf32>
    %186 = arith.mulf %0, %185 : vector<8x512xf32>
    %187 = vector.broadcast %183 : f32 to vector<8x512xf32>
    %188 = arith.addf %186, %187 : vector<8x512xf32>
    %cst_97 = arith.constant 0.000000e+00 : f32
    %189 = vector.broadcast %cst_97 : f32 to vector<8x512xf32>
    %190 = arith.maximumf %188, %189 : vector<8x512xf32>
    %191 = vector.broadcast %184 : f32 to vector<8x512xf32>
    %192 = arith.mulf %191, %190 : vector<8x512xf32>
    %193 = arith.addf %181, %192 : vector<8x512xf32>
    %c0_98 = arith.constant 0 : index
    %c16 = arith.constant 16 : index
    %194 = memref.load %arg1[%c0_98, %c16] : memref<4x32xf32, #tpu.memory_space<smem>>
    %c1_99 = arith.constant 1 : index
    %c16_100 = arith.constant 16 : index
    %195 = memref.load %arg1[%c1_99, %c16_100] : memref<4x32xf32, #tpu.memory_space<smem>>
    %c2_101 = arith.constant 2 : index
    %c16_102 = arith.constant 16 : index
    %196 = memref.load %arg1[%c2_101, %c16_102] : memref<4x32xf32, #tpu.memory_space<smem>>
    %197 = vector.broadcast %194 : f32 to vector<8x512xf32>
    %198 = arith.mulf %0, %197 : vector<8x512xf32>
    %199 = vector.broadcast %195 : f32 to vector<8x512xf32>
    %200 = arith.addf %198, %199 : vector<8x512xf32>
    %cst_103 = arith.constant 0.000000e+00 : f32
    %201 = vector.broadcast %cst_103 : f32 to vector<8x512xf32>
    %202 = arith.maximumf %200, %201 : vector<8x512xf32>
    %203 = vector.broadcast %196 : f32 to vector<8x512xf32>
    %204 = arith.mulf %203, %202 : vector<8x512xf32>
    %205 = arith.addf %193, %204 : vector<8x512xf32>
    %c0_104 = arith.constant 0 : index
    %c17 = arith.constant 17 : index
    %206 = memref.load %arg1[%c0_104, %c17] : memref<4x32xf32, #tpu.memory_space<smem>>
    %c1_105 = arith.constant 1 : index
    %c17_106 = arith.constant 17 : index
    %207 = memref.load %arg1[%c1_105, %c17_106] : memref<4x32xf32, #tpu.memory_space<smem>>
    %c2_107 = arith.constant 2 : index
    %c17_108 = arith.constant 17 : index
    %208 = memref.load %arg1[%c2_107, %c17_108] : memref<4x32xf32, #tpu.memory_space<smem>>
    %209 = vector.broadcast %206 : f32 to vector<8x512xf32>
    %210 = arith.mulf %0, %209 : vector<8x512xf32>
    %211 = vector.broadcast %207 : f32 to vector<8x512xf32>
    %212 = arith.addf %210, %211 : vector<8x512xf32>
    %cst_109 = arith.constant 0.000000e+00 : f32
    %213 = vector.broadcast %cst_109 : f32 to vector<8x512xf32>
    %214 = arith.maximumf %212, %213 : vector<8x512xf32>
    %215 = vector.broadcast %208 : f32 to vector<8x512xf32>
    %216 = arith.mulf %215, %214 : vector<8x512xf32>
    %217 = arith.addf %205, %216 : vector<8x512xf32>
    %c0_110 = arith.constant 0 : index
    %c18 = arith.constant 18 : index
    %218 = memref.load %arg1[%c0_110, %c18] : memref<4x32xf32, #tpu.memory_space<smem>>
    %c1_111 = arith.constant 1 : index
    %c18_112 = arith.constant 18 : index
    %219 = memref.load %arg1[%c1_111, %c18_112] : memref<4x32xf32, #tpu.memory_space<smem>>
    %c2_113 = arith.constant 2 : index
    %c18_114 = arith.constant 18 : index
    %220 = memref.load %arg1[%c2_113, %c18_114] : memref<4x32xf32, #tpu.memory_space<smem>>
    %221 = vector.broadcast %218 : f32 to vector<8x512xf32>
    %222 = arith.mulf %0, %221 : vector<8x512xf32>
    %223 = vector.broadcast %219 : f32 to vector<8x512xf32>
    %224 = arith.addf %222, %223 : vector<8x512xf32>
    %cst_115 = arith.constant 0.000000e+00 : f32
    %225 = vector.broadcast %cst_115 : f32 to vector<8x512xf32>
    %226 = arith.maximumf %224, %225 : vector<8x512xf32>
    %227 = vector.broadcast %220 : f32 to vector<8x512xf32>
    %228 = arith.mulf %227, %226 : vector<8x512xf32>
    %229 = arith.addf %217, %228 : vector<8x512xf32>
    %c0_116 = arith.constant 0 : index
    %c19 = arith.constant 19 : index
    %230 = memref.load %arg1[%c0_116, %c19] : memref<4x32xf32, #tpu.memory_space<smem>>
    %c1_117 = arith.constant 1 : index
    %c19_118 = arith.constant 19 : index
    %231 = memref.load %arg1[%c1_117, %c19_118] : memref<4x32xf32, #tpu.memory_space<smem>>
    %c2_119 = arith.constant 2 : index
    %c19_120 = arith.constant 19 : index
    %232 = memref.load %arg1[%c2_119, %c19_120] : memref<4x32xf32, #tpu.memory_space<smem>>
    %233 = vector.broadcast %230 : f32 to vector<8x512xf32>
    %234 = arith.mulf %0, %233 : vector<8x512xf32>
    %235 = vector.broadcast %231 : f32 to vector<8x512xf32>
    %236 = arith.addf %234, %235 : vector<8x512xf32>
    %cst_121 = arith.constant 0.000000e+00 : f32
    %237 = vector.broadcast %cst_121 : f32 to vector<8x512xf32>
    %238 = arith.maximumf %236, %237 : vector<8x512xf32>
    %239 = vector.broadcast %232 : f32 to vector<8x512xf32>
    %240 = arith.mulf %239, %238 : vector<8x512xf32>
    %241 = arith.addf %229, %240 : vector<8x512xf32>
    %c0_122 = arith.constant 0 : index
    %c20 = arith.constant 20 : index
    %242 = memref.load %arg1[%c0_122, %c20] : memref<4x32xf32, #tpu.memory_space<smem>>
    %c1_123 = arith.constant 1 : index
    %c20_124 = arith.constant 20 : index
    %243 = memref.load %arg1[%c1_123, %c20_124] : memref<4x32xf32, #tpu.memory_space<smem>>
    %c2_125 = arith.constant 2 : index
    %c20_126 = arith.constant 20 : index
    %244 = memref.load %arg1[%c2_125, %c20_126] : memref<4x32xf32, #tpu.memory_space<smem>>
    %245 = vector.broadcast %242 : f32 to vector<8x512xf32>
    %246 = arith.mulf %0, %245 : vector<8x512xf32>
    %247 = vector.broadcast %243 : f32 to vector<8x512xf32>
    %248 = arith.addf %246, %247 : vector<8x512xf32>
    %cst_127 = arith.constant 0.000000e+00 : f32
    %249 = vector.broadcast %cst_127 : f32 to vector<8x512xf32>
    %250 = arith.maximumf %248, %249 : vector<8x512xf32>
    %251 = vector.broadcast %244 : f32 to vector<8x512xf32>
    %252 = arith.mulf %251, %250 : vector<8x512xf32>
    %253 = arith.addf %241, %252 : vector<8x512xf32>
    %c0_128 = arith.constant 0 : index
    %c21 = arith.constant 21 : index
    %254 = memref.load %arg1[%c0_128, %c21] : memref<4x32xf32, #tpu.memory_space<smem>>
    %c1_129 = arith.constant 1 : index
    %c21_130 = arith.constant 21 : index
    %255 = memref.load %arg1[%c1_129, %c21_130] : memref<4x32xf32, #tpu.memory_space<smem>>
    %c2_131 = arith.constant 2 : index
    %c21_132 = arith.constant 21 : index
    %256 = memref.load %arg1[%c2_131, %c21_132] : memref<4x32xf32, #tpu.memory_space<smem>>
    %257 = vector.broadcast %254 : f32 to vector<8x512xf32>
    %258 = arith.mulf %0, %257 : vector<8x512xf32>
    %259 = vector.broadcast %255 : f32 to vector<8x512xf32>
    %260 = arith.addf %258, %259 : vector<8x512xf32>
    %cst_133 = arith.constant 0.000000e+00 : f32
    %261 = vector.broadcast %cst_133 : f32 to vector<8x512xf32>
    %262 = arith.maximumf %260, %261 : vector<8x512xf32>
    %263 = vector.broadcast %256 : f32 to vector<8x512xf32>
    %264 = arith.mulf %263, %262 : vector<8x512xf32>
    %265 = arith.addf %253, %264 : vector<8x512xf32>
    %c0_134 = arith.constant 0 : index
    %c22 = arith.constant 22 : index
    %266 = memref.load %arg1[%c0_134, %c22] : memref<4x32xf32, #tpu.memory_space<smem>>
    %c1_135 = arith.constant 1 : index
    %c22_136 = arith.constant 22 : index
    %267 = memref.load %arg1[%c1_135, %c22_136] : memref<4x32xf32, #tpu.memory_space<smem>>
    %c2_137 = arith.constant 2 : index
    %c22_138 = arith.constant 22 : index
    %268 = memref.load %arg1[%c2_137, %c22_138] : memref<4x32xf32, #tpu.memory_space<smem>>
    %269 = vector.broadcast %266 : f32 to vector<8x512xf32>
    %270 = arith.mulf %0, %269 : vector<8x512xf32>
    %271 = vector.broadcast %267 : f32 to vector<8x512xf32>
    %272 = arith.addf %270, %271 : vector<8x512xf32>
    %cst_139 = arith.constant 0.000000e+00 : f32
    %273 = vector.broadcast %cst_139 : f32 to vector<8x512xf32>
    %274 = arith.maximumf %272, %273 : vector<8x512xf32>
    %275 = vector.broadcast %268 : f32 to vector<8x512xf32>
    %276 = arith.mulf %275, %274 : vector<8x512xf32>
    %277 = arith.addf %265, %276 : vector<8x512xf32>
    %c0_140 = arith.constant 0 : index
    %c23 = arith.constant 23 : index
    %278 = memref.load %arg1[%c0_140, %c23] : memref<4x32xf32, #tpu.memory_space<smem>>
    %c1_141 = arith.constant 1 : index
    %c23_142 = arith.constant 23 : index
    %279 = memref.load %arg1[%c1_141, %c23_142] : memref<4x32xf32, #tpu.memory_space<smem>>
    %c2_143 = arith.constant 2 : index
    %c23_144 = arith.constant 23 : index
    %280 = memref.load %arg1[%c2_143, %c23_144] : memref<4x32xf32, #tpu.memory_space<smem>>
    %281 = vector.broadcast %278 : f32 to vector<8x512xf32>
    %282 = arith.mulf %0, %281 : vector<8x512xf32>
    %283 = vector.broadcast %279 : f32 to vector<8x512xf32>
    %284 = arith.addf %282, %283 : vector<8x512xf32>
    %cst_145 = arith.constant 0.000000e+00 : f32
    %285 = vector.broadcast %cst_145 : f32 to vector<8x512xf32>
    %286 = arith.maximumf %284, %285 : vector<8x512xf32>
    %287 = vector.broadcast %280 : f32 to vector<8x512xf32>
    %288 = arith.mulf %287, %286 : vector<8x512xf32>
    %289 = arith.addf %277, %288 : vector<8x512xf32>
    %c0_146 = arith.constant 0 : index
    %c24 = arith.constant 24 : index
    %290 = memref.load %arg1[%c0_146, %c24] : memref<4x32xf32, #tpu.memory_space<smem>>
    %c1_147 = arith.constant 1 : index
    %c24_148 = arith.constant 24 : index
    %291 = memref.load %arg1[%c1_147, %c24_148] : memref<4x32xf32, #tpu.memory_space<smem>>
    %c2_149 = arith.constant 2 : index
    %c24_150 = arith.constant 24 : index
    %292 = memref.load %arg1[%c2_149, %c24_150] : memref<4x32xf32, #tpu.memory_space<smem>>
    %293 = vector.broadcast %290 : f32 to vector<8x512xf32>
    %294 = arith.mulf %0, %293 : vector<8x512xf32>
    %295 = vector.broadcast %291 : f32 to vector<8x512xf32>
    %296 = arith.addf %294, %295 : vector<8x512xf32>
    %cst_151 = arith.constant 0.000000e+00 : f32
    %297 = vector.broadcast %cst_151 : f32 to vector<8x512xf32>
    %298 = arith.maximumf %296, %297 : vector<8x512xf32>
    %299 = vector.broadcast %292 : f32 to vector<8x512xf32>
    %300 = arith.mulf %299, %298 : vector<8x512xf32>
    %301 = arith.addf %289, %300 : vector<8x512xf32>
    %c0_152 = arith.constant 0 : index
    %c25 = arith.constant 25 : index
    %302 = memref.load %arg1[%c0_152, %c25] : memref<4x32xf32, #tpu.memory_space<smem>>
    %c1_153 = arith.constant 1 : index
    %c25_154 = arith.constant 25 : index
    %303 = memref.load %arg1[%c1_153, %c25_154] : memref<4x32xf32, #tpu.memory_space<smem>>
    %c2_155 = arith.constant 2 : index
    %c25_156 = arith.constant 25 : index
    %304 = memref.load %arg1[%c2_155, %c25_156] : memref<4x32xf32, #tpu.memory_space<smem>>
    %305 = vector.broadcast %302 : f32 to vector<8x512xf32>
    %306 = arith.mulf %0, %305 : vector<8x512xf32>
    %307 = vector.broadcast %303 : f32 to vector<8x512xf32>
    %308 = arith.addf %306, %307 : vector<8x512xf32>
    %cst_157 = arith.constant 0.000000e+00 : f32
    %309 = vector.broadcast %cst_157 : f32 to vector<8x512xf32>
    %310 = arith.maximumf %308, %309 : vector<8x512xf32>
    %311 = vector.broadcast %304 : f32 to vector<8x512xf32>
    %312 = arith.mulf %311, %310 : vector<8x512xf32>
    %313 = arith.addf %301, %312 : vector<8x512xf32>
    %c0_158 = arith.constant 0 : index
    %c26 = arith.constant 26 : index
    %314 = memref.load %arg1[%c0_158, %c26] : memref<4x32xf32, #tpu.memory_space<smem>>
    %c1_159 = arith.constant 1 : index
    %c26_160 = arith.constant 26 : index
    %315 = memref.load %arg1[%c1_159, %c26_160] : memref<4x32xf32, #tpu.memory_space<smem>>
    %c2_161 = arith.constant 2 : index
    %c26_162 = arith.constant 26 : index
    %316 = memref.load %arg1[%c2_161, %c26_162] : memref<4x32xf32, #tpu.memory_space<smem>>
    %317 = vector.broadcast %314 : f32 to vector<8x512xf32>
    %318 = arith.mulf %0, %317 : vector<8x512xf32>
    %319 = vector.broadcast %315 : f32 to vector<8x512xf32>
    %320 = arith.addf %318, %319 : vector<8x512xf32>
    %cst_163 = arith.constant 0.000000e+00 : f32
    %321 = vector.broadcast %cst_163 : f32 to vector<8x512xf32>
    %322 = arith.maximumf %320, %321 : vector<8x512xf32>
    %323 = vector.broadcast %316 : f32 to vector<8x512xf32>
    %324 = arith.mulf %323, %322 : vector<8x512xf32>
    %325 = arith.addf %313, %324 : vector<8x512xf32>
    %c0_164 = arith.constant 0 : index
    %c27 = arith.constant 27 : index
    %326 = memref.load %arg1[%c0_164, %c27] : memref<4x32xf32, #tpu.memory_space<smem>>
    %c1_165 = arith.constant 1 : index
    %c27_166 = arith.constant 27 : index
    %327 = memref.load %arg1[%c1_165, %c27_166] : memref<4x32xf32, #tpu.memory_space<smem>>
    %c2_167 = arith.constant 2 : index
    %c27_168 = arith.constant 27 : index
    %328 = memref.load %arg1[%c2_167, %c27_168] : memref<4x32xf32, #tpu.memory_space<smem>>
    %329 = vector.broadcast %326 : f32 to vector<8x512xf32>
    %330 = arith.mulf %0, %329 : vector<8x512xf32>
    %331 = vector.broadcast %327 : f32 to vector<8x512xf32>
    %332 = arith.addf %330, %331 : vector<8x512xf32>
    %cst_169 = arith.constant 0.000000e+00 : f32
    %333 = vector.broadcast %cst_169 : f32 to vector<8x512xf32>
    %334 = arith.maximumf %332, %333 : vector<8x512xf32>
    %335 = vector.broadcast %328 : f32 to vector<8x512xf32>
    %336 = arith.mulf %335, %334 : vector<8x512xf32>
    %337 = arith.addf %325, %336 : vector<8x512xf32>
    %c0_170 = arith.constant 0 : index
    %c28 = arith.constant 28 : index
    %338 = memref.load %arg1[%c0_170, %c28] : memref<4x32xf32, #tpu.memory_space<smem>>
    %c1_171 = arith.constant 1 : index
    %c28_172 = arith.constant 28 : index
    %339 = memref.load %arg1[%c1_171, %c28_172] : memref<4x32xf32, #tpu.memory_space<smem>>
    %c2_173 = arith.constant 2 : index
    %c28_174 = arith.constant 28 : index
    %340 = memref.load %arg1[%c2_173, %c28_174] : memref<4x32xf32, #tpu.memory_space<smem>>
    %341 = vector.broadcast %338 : f32 to vector<8x512xf32>
    %342 = arith.mulf %0, %341 : vector<8x512xf32>
    %343 = vector.broadcast %339 : f32 to vector<8x512xf32>
    %344 = arith.addf %342, %343 : vector<8x512xf32>
    %cst_175 = arith.constant 0.000000e+00 : f32
    %345 = vector.broadcast %cst_175 : f32 to vector<8x512xf32>
    %346 = arith.maximumf %344, %345 : vector<8x512xf32>
    %347 = vector.broadcast %340 : f32 to vector<8x512xf32>
    %348 = arith.mulf %347, %346 : vector<8x512xf32>
    %349 = arith.addf %337, %348 : vector<8x512xf32>
    %c0_176 = arith.constant 0 : index
    %c29 = arith.constant 29 : index
    %350 = memref.load %arg1[%c0_176, %c29] : memref<4x32xf32, #tpu.memory_space<smem>>
    %c1_177 = arith.constant 1 : index
    %c29_178 = arith.constant 29 : index
    %351 = memref.load %arg1[%c1_177, %c29_178] : memref<4x32xf32, #tpu.memory_space<smem>>
    %c2_179 = arith.constant 2 : index
    %c29_180 = arith.constant 29 : index
    %352 = memref.load %arg1[%c2_179, %c29_180] : memref<4x32xf32, #tpu.memory_space<smem>>
    %353 = vector.broadcast %350 : f32 to vector<8x512xf32>
    %354 = arith.mulf %0, %353 : vector<8x512xf32>
    %355 = vector.broadcast %351 : f32 to vector<8x512xf32>
    %356 = arith.addf %354, %355 : vector<8x512xf32>
    %cst_181 = arith.constant 0.000000e+00 : f32
    %357 = vector.broadcast %cst_181 : f32 to vector<8x512xf32>
    %358 = arith.maximumf %356, %357 : vector<8x512xf32>
    %359 = vector.broadcast %352 : f32 to vector<8x512xf32>
    %360 = arith.mulf %359, %358 : vector<8x512xf32>
    %361 = arith.addf %349, %360 : vector<8x512xf32>
    %c0_182 = arith.constant 0 : index
    %c30 = arith.constant 30 : index
    %362 = memref.load %arg1[%c0_182, %c30] : memref<4x32xf32, #tpu.memory_space<smem>>
    %c1_183 = arith.constant 1 : index
    %c30_184 = arith.constant 30 : index
    %363 = memref.load %arg1[%c1_183, %c30_184] : memref<4x32xf32, #tpu.memory_space<smem>>
    %c2_185 = arith.constant 2 : index
    %c30_186 = arith.constant 30 : index
    %364 = memref.load %arg1[%c2_185, %c30_186] : memref<4x32xf32, #tpu.memory_space<smem>>
    %365 = vector.broadcast %362 : f32 to vector<8x512xf32>
    %366 = arith.mulf %0, %365 : vector<8x512xf32>
    %367 = vector.broadcast %363 : f32 to vector<8x512xf32>
    %368 = arith.addf %366, %367 : vector<8x512xf32>
    %cst_187 = arith.constant 0.000000e+00 : f32
    %369 = vector.broadcast %cst_187 : f32 to vector<8x512xf32>
    %370 = arith.maximumf %368, %369 : vector<8x512xf32>
    %371 = vector.broadcast %364 : f32 to vector<8x512xf32>
    %372 = arith.mulf %371, %370 : vector<8x512xf32>
    %373 = arith.addf %361, %372 : vector<8x512xf32>
    %c0_188 = arith.constant 0 : index
    %c31 = arith.constant 31 : index
    %374 = memref.load %arg1[%c0_188, %c31] : memref<4x32xf32, #tpu.memory_space<smem>>
    %c1_189 = arith.constant 1 : index
    %c31_190 = arith.constant 31 : index
    %375 = memref.load %arg1[%c1_189, %c31_190] : memref<4x32xf32, #tpu.memory_space<smem>>
    %c2_191 = arith.constant 2 : index
    %c31_192 = arith.constant 31 : index
    %376 = memref.load %arg1[%c2_191, %c31_192] : memref<4x32xf32, #tpu.memory_space<smem>>
    %377 = vector.broadcast %374 : f32 to vector<8x512xf32>
    %378 = arith.mulf %0, %377 : vector<8x512xf32>
    %379 = vector.broadcast %375 : f32 to vector<8x512xf32>
    %380 = arith.addf %378, %379 : vector<8x512xf32>
    %cst_193 = arith.constant 0.000000e+00 : f32
    %381 = vector.broadcast %cst_193 : f32 to vector<8x512xf32>
    %382 = arith.maximumf %380, %381 : vector<8x512xf32>
    %383 = vector.broadcast %376 : f32 to vector<8x512xf32>
    %384 = arith.mulf %383, %382 : vector<8x512xf32>
    %385 = arith.addf %373, %384 : vector<8x512xf32>
    %c3_194 = arith.constant 3 : index
    %c0_195 = arith.constant 0 : index
    %386 = memref.load %arg1[%c3_194, %c0_195] : memref<4x32xf32, #tpu.memory_space<smem>>
    %387 = vector.broadcast %386 : f32 to vector<8x512xf32>
    %388 = arith.addf %385, %387 : vector<8x512xf32>
    %c0_196 = arith.constant 0 : index
    %c0_197 = arith.constant 0 : index
    %389 = vector.load %arg3[%c0_196, %c0_197] : memref<8x512xf32, #tpu.memory_space<vmem>>, vector<8x512xf32>
    tpu.vector_store %arg3[%c0_196, %c0_197], %388 {strides = array<i32>} : memref<8x512xf32, #tpu.memory_space<vmem>>, vector<8x512xf32>,
    return
  }
  func.func @transform_0(%arg0: i32) -> (i32, i32) {
    %c0_i32 = arith.constant 0 : i32
    %c0_i32_0 = arith.constant 0 : i32
    %c0_i32_1 = arith.constant 0 : i32
    return %c0_i32, %c0_i32_0 : i32, i32
  }
  func.func @transform_1(%arg0: i32) -> (i32, i32) {
    %c0_i32 = arith.constant 0 : i32
    %c0_i32_0 = arith.constant 0 : i32
    return %arg0, %c0_i32 : i32, i32
  }
  func.func @transform_2(%arg0: i32) -> (i32, i32) {
    %c0_i32 = arith.constant 0 : i32
    %c0_i32_0 = arith.constant 0 : i32
    return %arg0, %c0_i32 : i32, i32
  }
}

</mosaic_0001>

<bundles_post_ra>
// kernel: modelo_ventas_forward.1
= control target key start
LH: loop header
LB: loop body
LE: loop exit
PB: predicated region body
PF: predicated region fallthrough
CT: control target
= control target key end

     0   :  { %7 = vsyncpa [#allocation3], 0  ;;  %s1462_s0 = inlined_call_operand.vmem [shape: f32[4,32], index: 0, kind: input, shape index: {}]   ;;  %s1463_s1 = inlined_call_operand.vmem [shape: f32[8,512], index: 1, kind: input, shape index: {}]   ;;  %s1464_s2 = inlined_call_operand.vmem [shape: f32[8,512], index: 2, kind: output, shape index: {}]  }
   0x1   :  { %s14_s11 = sshll.u32 %s1462_s0, 4  ;;  %s15_s11 = int_to_ptr.vmem [resolvable:$true] %s14_s11 }
   0x2   :  { %s976_s12 = scalar_lea.vmem %s15_s11, 64  ;;  %p981_p1 = scmp.lt.s32.totalorder %s15_s11, %s15_s11 }
   0x3   :  { %p977_p0 = scmp.ne.s32.totalorder %s15_s11, %s976_s12  ;;  %p982_p2 = scmp.lt.s32.totalorder %s976_s12, %s976_s12 }
   0x5   :  { %p983_p3 = por %p982_p2, %p981_p1 }
   0x7   :  { %p984_p4 = pnand %p983_p3, %p977_p0 }
   0x9   :  { %987 = shalt.err (!%p984_p4)
}
   0xa   :  { %s990_s13 = smov [#allocation2]  }
   0xb   :  { %17 = dma.vmem_to_smem %s15_s11, 64, %s990_s13, [#allocation3]  }
   0xc   :  { %988 = dma.done.wait [#allocation3], 64  }
   0xd   :  { %989 = vsyncadd [#allocation3], 4294967232 }
   0xe   :  { %23 = sfence }
   0xf   :  { %s28_s14 = sld [smem:[#allocation2]]  ;;  %s877_s17 = sld [smem:[#allocation2 + $0x1]]  ;;  %v1012_v0 = vld [vmem:[%s1463_s1] sm:$0xff]  ;;  %v1017_v1 = vld [vmem:[%s1463_s1 + $0x8] sm:$0xff]  ;;  %v1022_v2 = vld [vmem:[%s1463_s1 + $0x10] sm:$0xff] }
  0x10   :  { %s875_s15 = sld [smem:[#allocation2 + $0x80]]  ;;  %s878_s18 = sld [smem:[#allocation2 + $0x81]]  ;;  %v1027_v3 = vld [vmem:[%s1463_s1 + $0x18] sm:$0xff] }
  0x11   :  { %s876_s16 = sld [smem:[#allocation2 + $0x100]]  ;;  %s1029_s26 = sld [smem:[#allocation2 + $0x101]] }
  0x12   :  { %s1031_s27 = sld [smem:[#allocation2 + $0x2]]  ;;  %s1045_s30 = sld [smem:[#allocation2 + $0x3]] }
  0x13   :  { %s1037_s28 = sld [smem:[#allocation2 + $0x82]]  ;;  %s1047_s3 = sld [smem:[#allocation2 + $0x83]] }
  0x14   :  { %s1039_s29 = sld [smem:[#allocation2 + $0x102]]  ;;  %s1049_s4 = sld [smem:[#allocation2 + $0x103]] }
  0x15   :  { %v31_v4 = vstv %s28_s14  ;;  %v57_v11 = vstv %s877_s17  ;;  %s1051_s5 = sld [smem:[#allocation2 + $0x4]]  ;;  %s1069_s8 = sld [smem:[#allocation2 + $0x5]] }
  0x16   :  { %v32_v5 = vmul.f32 %v31_v4, %v1012_v0  ;;  %v33_v6 = vmul.f32 %v31_v4, %v1017_v1  ;;  %v34_v7 = vmul.f32 %v31_v4, %v1022_v2  ;;  %v35_v8 = vmul.f32 %v31_v4, %v1027_v3  ;;  %s1061_s6 = sld [smem:[#allocation2 + $0x84]]  ;;  %s1071_s9 = sld [smem:[#allocation2 + $0x85]] }
  0x17   :  { %v36_v9 = vstv %s875_s15  ;;  %v45_v10 = vstv %s876_s16  ;;  %v62_v12 = vstv %s878_s18  ;;  %v58_v17 = vmul.f32 %v57_v11, %v1012_v0  ;;  %s1066_s7 = sld [smem:[#allocation2 + $0x104]]  ;;  %s1083_s10 = sld [smem:[#allocation2 + $0x105]] }
  0x18   :  { %v37_v13 = vadd.f32 %v36_v9, %v32_v5  ;;  %v38_v14 = vadd.f32 %v36_v9, %v33_v6  ;;  %v39_v15 = vadd.f32 %v36_v9, %v34_v7  ;;  %v40_v16 = vadd.f32 %v36_v9, %v35_v8  ;;  %s1087_s11 = sld [smem:[#allocation2 + $0x6]]  ;;  %s1097_s14 = sld [smem:[#allocation2 + $0x7]] }
  0x19   :  { %v59_v18 = vmul.f32 %v57_v11, %v1017_v1  ;;  %v60_v19 = vmul.f32 %v57_v11, %v1022_v2  ;;  %v61_v20 = vmul.f32 %v57_v11, %v1027_v3  ;;  %v63_v25 = vadd.f32 %v62_v12, %v58_v17  ;;  %s1089_s12 = sld [smem:[#allocation2 + $0x86]]  ;;  %s1099_s15 = sld [smem:[#allocation2 + $0x87]] }
  0x1a   :  { %v41_v21 = vmax.f32 %v37_v13, 0.0  ;;  %v42_v22 = vmax.f32 %v38_v14, 0.0  ;;  %v43_v23 = vmax.f32 %v39_v15, 0.0  ;;  %v44_v24 = vmax.f32 %v40_v16, 0.0  ;;  %s1091_s13 = sld [smem:[#allocation2 + $0x106]]  ;;  %s1101_s16 = sld [smem:[#allocation2 + $0x107]] }
  0x1b   :  { %v64_v26 = vadd.f32 %v62_v12, %v59_v18  ;;  %v65_v27 = vadd.f32 %v62_v12, %v60_v19  ;;  %v66_v28 = vadd.f32 %v62_v12, %v61_v20  ;;  %v67_v33 = vmax.f32 %v63_v25, 0.0  ;;  %s1103_s17 = sld [smem:[#allocation2 + $0x8]]  ;;  %s1121_s0 = sld [smem:[#allocation2 + $0x9]] }
  0x1c   :  { %v46_v29 = vmul.f32 %v45_v10, %v41_v21  ;;  %v47_v30 = vmul.f32 %v45_v10, %v42_v22  ;;  %v48_v31 = vmul.f32 %v45_v10, %v43_v23  ;;  %v49_v32 = vmul.f32 %v45_v10, %v44_v24  ;;  %s1113_s18 = sld [smem:[#allocation2 + $0x88]]  ;;  %s1123_s20 = sld [smem:[#allocation2 + $0x89]] }
  0x1d   :  { %v68_v34 = vmax.f32 %v64_v26, 0.0  ;;  %v69_v35 = vmax.f32 %v65_v27, 0.0  ;;  %v70_v36 = vmax.f32 %v66_v28, 0.0  ;;  %v71_v37 = vstv %s1029_s26  ;;  %s1118_s19 = sld [smem:[#allocation2 + $0x108]]  ;;  %s1135_s21 = sld [smem:[#allocation2 + $0x109]] }
  0x1e   :  { %v83_v38 = vstv %s1031_s27  ;;  %v88_v39 = vstv %s1037_s28  ;;  %v97_v40 = vstv %s1039_s29  ;;  %v72_v41 = vmul.f32 %v71_v37, %v67_v33  ;;  %s1139_s22 = sld [smem:[#allocation2 + $0xa]]  ;;  %s1149_s25 = sld [smem:[#allocation2 + $0xb]] }
  0x1f   :  { %v73_v42 = vmul.f32 %v71_v37, %v68_v34  ;;  %v74_v43 = vmul.f32 %v71_v37, %v69_v35  ;;  %v75_v44 = vmul.f32 %v71_v37, %v70_v36  ;;  %v84_v45 = vmul.f32 %v83_v38, %v1012_v0  ;;  %s1141_s23 = sld [smem:[#allocation2 + $0x8a]]  ;;  %s1151_s26 = sld [smem:[#allocation2 + $0x8b]] }
  0x20   :  { %v85_v46 = vmul.f32 %v83_v38, %v1017_v1  ;;  %v86_v47 = vmul.f32 %v83_v38, %v1022_v2  ;;  %v87_v48 = vmul.f32 %v83_v38, %v1027_v3  ;;  %v76_v49 = vadd.f32 %v72_v41, %v46_v29  ;;  %s1143_s24 = sld [smem:[#allocation2 + $0x10a]]  ;;  %s1153_s27 = sld [smem:[#allocation2 + $0x10b]] }
  0x21   :  { %v77_v50 = vadd.f32 %v73_v42, %v47_v30  ;;  %v78_v51 = vadd.f32 %v74_v43, %v48_v31  ;;  %v79_v52 = vadd.f32 %v75_v44, %v49_v32  ;;  %v89_v53 = vadd.f32 %v88_v39, %v84_v45  ;;  %s1155_s28 = sld [smem:[#allocation2 + $0xc]] }
  0x22   :  { %v90_v54 = vadd.f32 %v88_v39, %v85_v46  ;;  %v91_v55 = vadd.f32 %v88_v39, %v86_v47  ;;  %v92_v56 = vadd.f32 %v88_v39, %v87_v48  ;;  %v109_v57 = vstv %s1045_s30  ;;  %s1165_s29 = sld [smem:[#allocation2 + $0x8c]] }
  0x23   :  { %v114_v58 = vstv %s1047_s3  ;;  %v123_v59 = vstv %s1049_s4  ;;  %v135_v60 = vstv %s1051_s5  ;;  %v93_v61 = vmax.f32 %v89_v53, 0.0  ;;  %s1170_s30 = sld [smem:[#allocation2 + $0x10c]]  ;;  %s1173_s3 = sld [smem:[#allocation2 + $0xd]] }
  0x24   :  { %v94_v62 = vmax.f32 %v90_v54, 0.0  ;;  %v95_v63 = vmax.f32 %v91_v55, 0.0  ;;  %v96_v4 = vmax.f32 %v92_v56, 0.0  ;;  %v110_v5 = vmul.f32 %v109_v57, %v1012_v0  ;;  %s1175_s4 = sld [smem:[#allocation2 + $0x8d]] }
  0x25   :  { %v111_v6 = vmul.f32 %v109_v57, %v1017_v1  ;;  %v112_v7 = vmul.f32 %v109_v57, %v1022_v2  ;;  %v113_v8 = vmul.f32 %v109_v57, %v1027_v3  ;;  %v98_v9 = vmul.f32 %v97_v40, %v93_v61  ;;  %s1187_s5 = sld [smem:[#allocation2 + $0x10d]] }
  0x26   :  { %v99_v10 = vmul.f32 %v97_v40, %v94_v62  ;;  %v100_v11 = vmul.f32 %v97_v40, %v95_v63  ;;  %v101_v12 = vmul.f32 %v97_v40, %v96_v4  ;;  %v115_v13 = vadd.f32 %v114_v58, %v110_v5 }
  0x27   :  { %v116_v14 = vadd.f32 %v114_v58, %v111_v6  ;;  %v117_v15 = vadd.f32 %v114_v58, %v112_v7  ;;  %v118_v16 = vadd.f32 %v114_v58, %v113_v8  ;;  %v102_v17 = vadd.f32 %v98_v9, %v76_v49 }
  0x28   :  { %v103_v18 = vadd.f32 %v99_v10, %v77_v50  ;;  %v104_v19 = vadd.f32 %v100_v11, %v78_v51  ;;  %v105_v20 = vadd.f32 %v101_v12, %v79_v52  ;;  %v119_v21 = vmax.f32 %v115_v13, 0.0 }
  0x29   :  { %v120_v22 = vmax.f32 %v116_v14, 0.0  ;;  %v121_v23 = vmax.f32 %v117_v15, 0.0  ;;  %v122_v24 = vmax.f32 %v118_v16, 0.0  ;;  %v136_v25 = vmul.f32 %v135_v60, %v1012_v0 }
  0x2a   :  { %v137_v26 = vmul.f32 %v135_v60, %v1017_v1  ;;  %v138_v27 = vmul.f32 %v135_v60, %v1022_v2  ;;  %v139_v28 = vmul.f32 %v135_v60, %v1027_v3  ;;  %v124_v29 = vmul.f32 %v123_v59, %v119_v21 }
  0x2b   :  { %v125_v30 = vmul.f32 %v123_v59, %v120_v22  ;;  %v126_v31 = vmul.f32 %v123_v59, %v121_v23  ;;  %v127_v32 = vmul.f32 %v123_v59, %v122_v24  ;;  %v140_v33 = vstv %s1061_s6  ;;  %s1191_s6 = sld [smem:[#allocation2 + $0xe]] }
  0x2c   :  { %v149_v34 = vstv %s1066_s7  ;;  %v161_v35 = vstv %s1069_s8  ;;  %v166_v36 = vstv %s1071_s9  ;;  %v128_v37 = vadd.f32 %v124_v29, %v102_v17  ;;  %s1193_s7 = sld [smem:[#allocation2 + $0x8e]]  ;;  %s1201_s9 = sld [smem:[#allocation2 + $0xf]] }
  0x2d   :  { %v129_v38 = vadd.f32 %v125_v30, %v103_v18  ;;  %v130_v39 = vadd.f32 %v126_v31, %v104_v19  ;;  %v131_v40 = vadd.f32 %v127_v32, %v105_v20  ;;  %v141_v41 = vadd.f32 %v140_v33, %v136_v25  ;;  %s1195_s8 = sld [smem:[#allocation2 + $0x10e]] }
  0x2e   :  { %v142_v42 = vadd.f32 %v140_v33, %v137_v26  ;;  %v143_v43 = vadd.f32 %v140_v33, %v138_v27  ;;  %v144_v44 = vadd.f32 %v140_v33, %v139_v28  ;;  %v162_v45 = vmul.f32 %v161_v35, %v1012_v0 }
  0x2f   :  { %v163_v46 = vmul.f32 %v161_v35, %v1017_v1  ;;  %v164_v47 = vmul.f32 %v161_v35, %v1022_v2  ;;  %v165_v48 = vmul.f32 %v161_v35, %v1027_v3  ;;  %v145_v49 = vmax.f32 %v141_v41, 0.0 }
  0x30   :  { %v146_v50 = vmax.f32 %v142_v42, 0.0  ;;  %v147_v51 = vmax.f32 %v143_v43, 0.0  ;;  %v148_v52 = vmax.f32 %v144_v44, 0.0  ;;  %v167_v53 = vadd.f32 %v166_v36, %v162_v45 }
  0x31   :  { %v168_v54 = vadd.f32 %v166_v36, %v163_v46  ;;  %v169_v55 = vadd.f32 %v166_v36, %v164_v47  ;;  %v170_v56 = vadd.f32 %v166_v36, %v165_v48  ;;  %v150_v57 = vmul.f32 %v149_v34, %v145_v49 }
  0x32   :  { %v151_v58 = vmul.f32 %v149_v34, %v146_v50  ;;  %v152_v59 = vmul.f32 %v149_v34, %v147_v51  ;;  %v153_v60 = vmul.f32 %v149_v34, %v148_v52  ;;  %v171_v61 = vmax.f32 %v167_v53, 0.0 }
  0x33   :  { %v172_v62 = vmax.f32 %v168_v54, 0.0  ;;  %v173_v63 = vmax.f32 %v169_v55, 0.0  ;;  %v174_v4 = vmax.f32 %v170_v56, 0.0  ;;  %v154_v5 = vadd.f32 %v150_v57, %v128_v37 }
  0x34   :  { %v155_v6 = vadd.f32 %v151_v58, %v129_v38  ;;  %v156_v7 = vadd.f32 %v152_v59, %v130_v39  ;;  %v157_v8 = vadd.f32 %v153_v60, %v131_v40  ;;  %v175_v9 = vstv %s1083_s10  ;;  %s1203_s10 = sld [smem:[#allocation2 + $0x8f]] }
  0x35   :  { %v187_v10 = vstv %s1087_s11  ;;  %v192_v11 = vstv %s1089_s12  ;;  %v201_v12 = vstv %s1091_s13  ;;  %v176_v13 = vmul.f32 %v175_v9, %v171_v61  ;;  %s1205_s11 = sld [smem:[#allocation2 + $0x10f]]  ;;  %s1207_s12 = sld [smem:[#allocation2 + $0x10]] }
  0x36   :  { %v177_v14 = vmul.f32 %v175_v9, %v172_v62  ;;  %v178_v15 = vmul.f32 %v175_v9, %v173_v63  ;;  %v179_v16 = vmul.f32 %v175_v9, %v174_v4  ;;  %v188_v17 = vmul.f32 %v187_v10, %v1012_v0  ;;  %s1217_s13 = sld [smem:[#allocation2 + $0x90]] }
  0x37   :  { %v189_v18 = vmul.f32 %v187_v10, %v1017_v1  ;;  %v190_v19 = vmul.f32 %v187_v10, %v1022_v2  ;;  %v191_v20 = vmul.f32 %v187_v10, %v1027_v3  ;;  %v180_v21 = vadd.f32 %v176_v13, %v154_v5 }
  0x38   :  { %v181_v22 = vadd.f32 %v177_v14, %v155_v6  ;;  %v182_v23 = vadd.f32 %v178_v15, %v156_v7  ;;  %v183_v24 = vadd.f32 %v179_v16, %v157_v8  ;;  %v193_v25 = vadd.f32 %v192_v11, %v188_v17 }
  0x39   :  { %v194_v26 = vadd.f32 %v192_v11, %v189_v18  ;;  %v195_v27 = vadd.f32 %v192_v11, %v190_v19  ;;  %v196_v28 = vadd.f32 %v192_v11, %v191_v20  ;;  %v213_v29 = vstv %s1097_s14  ;;  %s1222_s14 = sld [smem:[#allocation2 + $0x110]] }
  0x3a   :  { %v218_v30 = vstv %s1099_s15  ;;  %v227_v31 = vstv %s1101_s16  ;;  %v239_v32 = vstv %s1103_s17  ;;  %v197_v33 = vmax.f32 %v193_v25, 0.0  ;;  %s1225_s15 = sld [smem:[#allocation2 + $0x11]] }
  0x3b   :  { %v198_v34 = vmax.f32 %v194_v26, 0.0  ;;  %v199_v35 = vmax.f32 %v195_v27, 0.0  ;;  %v200_v36 = vmax.f32 %v196_v28, 0.0  ;;  %v214_v37 = vmul.f32 %v213_v29, %v1012_v0  ;;  %s1227_s16 = sld [smem:[#allocation2 + $0x91]] }
  0x3c   :  { %v215_v38 = vmul.f32 %v213_v29, %v1017_v1  ;;  %v216_v39 = vmul.f32 %v213_v29, %v1022_v2  ;;  %v217_v40 = vmul.f32 %v213_v29, %v1027_v3  ;;  %v202_v41 = vmul.f32 %v201_v12, %v197_v33  ;;  %s1239_s17 = sld [smem:[#allocation2 + $0x111]] }
  0x3d   :  { %v203_v42 = vmul.f32 %v201_v12, %v198_v34  ;;  %v204_v43 = vmul.f32 %v201_v12, %v199_v35  ;;  %v205_v44 = vmul.f32 %v201_v12, %v200_v36  ;;  %v219_v45 = vadd.f32 %v218_v30, %v214_v37 }
  0x3e   :  { %v220_v46 = vadd.f32 %v218_v30, %v215_v38  ;;  %v221_v47 = vadd.f32 %v218_v30, %v216_v39  ;;  %v222_v48 = vadd.f32 %v218_v30, %v217_v40  ;;  %v206_v49 = vadd.f32 %v202_v41, %v180_v21 }
  0x3f   :  { %v207_v50 = vadd.f32 %v203_v42, %v181_v22  ;;  %v208_v51 = vadd.f32 %v204_v43, %v182_v23  ;;  %v209_v52 = vadd.f32 %v205_v44, %v183_v24  ;;  %v223_v53 = vmax.f32 %v219_v45, 0.0 }
  0x40   :  { %v224_v54 = vmax.f32 %v220_v46, 0.0  ;;  %v225_v55 = vmax.f32 %v221_v47, 0.0  ;;  %v226_v56 = vmax.f32 %v222_v48, 0.0  ;;  %v240_v57 = vmul.f32 %v239_v32, %v1012_v0 }
  0x41   :  { %v241_v58 = vmul.f32 %v239_v32, %v1017_v1  ;;  %v242_v59 = vmul.f32 %v239_v32, %v1022_v2  ;;  %v243_v60 = vmul.f32 %v239_v32, %v1027_v3  ;;  %v228_v61 = vmul.f32 %v227_v31, %v223_v53 }
  0x42   :  { %v229_v62 = vmul.f32 %v227_v31, %v224_v54  ;;  %v230_v63 = vmul.f32 %v227_v31, %v225_v55  ;;  %v231_v4 = vmul.f32 %v227_v31, %v226_v56  ;;  %v244_v5 = vstv %s1113_s18  ;;  %s1243_s18 = sld [smem:[#allocation2 + $0x12]] }
  0x43   :  { %v253_v6 = vstv %s1118_s19  ;;  %v265_v7 = vstv %s1121_s0  ;;  %v270_v8 = vstv %s1123_s20  ;;  %v232_v9 = vadd.f32 %v228_v61, %v206_v49  ;;  %s1245_s19 = sld [smem:[#allocation2 + $0x92]]  ;;  %s1253_s20 = sld [smem:[#allocation2 + $0x13]] }
  0x44   :  { %v233_v10 = vadd.f32 %v229_v62, %v207_v50  ;;  %v234_v11 = vadd.f32 %v230_v63, %v208_v51  ;;  %v235_v12 = vadd.f32 %v231_v4, %v209_v52  ;;  %v245_v13 = vadd.f32 %v244_v5, %v240_v57  ;;  %s1247_s0 = sld [smem:[#allocation2 + $0x112]] }
  0x45   :  { %v246_v14 = vadd.f32 %v244_v5, %v241_v58  ;;  %v247_v15 = vadd.f32 %v244_v5, %v242_v59  ;;  %v248_v16 = vadd.f32 %v244_v5, %v243_v60  ;;  %v266_v17 = vmul.f32 %v265_v7, %v1012_v0 }
  0x46   :  { %v267_v18 = vmul.f32 %v265_v7, %v1017_v1  ;;  %v268_v19 = vmul.f32 %v265_v7, %v1022_v2  ;;  %v269_v20 = vmul.f32 %v265_v7, %v1027_v3  ;;  %v249_v21 = vmax.f32 %v245_v13, 0.0 }
  0x47   :  { %v250_v22 = vmax.f32 %v246_v14, 0.0  ;;  %v251_v23 = vmax.f32 %v247_v15, 0.0  ;;  %v252_v24 = vmax.f32 %v248_v16, 0.0  ;;  %v271_v25 = vadd.f32 %v270_v8, %v266_v17 }
  0x48   :  { %v272_v26 = vadd.f32 %v270_v8, %v267_v18  ;;  %v273_v27 = vadd.f32 %v270_v8, %v268_v19  ;;  %v274_v28 = vadd.f32 %v270_v8, %v269_v20  ;;  %v254_v29 = vmul.f32 %v253_v6, %v249_v21 }
  0x49   :  { %v255_v30 = vmul.f32 %v253_v6, %v250_v22  ;;  %v256_v31 = vmul.f32 %v253_v6, %v251_v23  ;;  %v257_v32 = vmul.f32 %v253_v6, %v252_v24  ;;  %v275_v33 = vmax.f32 %v271_v25, 0.0 }
  0x4a   :  { %v276_v34 = vmax.f32 %v272_v26, 0.0  ;;  %v277_v35 = vmax.f32 %v273_v27, 0.0  ;;  %v278_v36 = vmax.f32 %v274_v28, 0.0  ;;  %v258_v37 = vadd.f32 %v254_v29, %v232_v9 }
  0x4b   :  { %v259_v38 = vadd.f32 %v255_v30, %v233_v10  ;;  %v260_v39 = vadd.f32 %v256_v31, %v234_v11  ;;  %v261_v40 = vadd.f32 %v257_v32, %v235_v12  ;;  %v279_v41 = vstv %s1135_s21  ;;  %s1255_s21 = sld [smem:[#allocation2 + $0x93]] }
  0x4c   :  { %v291_v42 = vstv %s1139_s22  ;;  %v296_v43 = vstv %s1141_s23  ;;  %v305_v44 = vstv %s1143_s24  ;;  %v280_v45 = vmul.f32 %v279_v41, %v275_v33  ;;  %s1257_s22 = sld [smem:[#allocation2 + $0x113]]  ;;  %s1259_s23 = sld [smem:[#allocation2 + $0x14]] }
  0x4d   :  { %v281_v46 = vmul.f32 %v279_v41, %v276_v34  ;;  %v282_v47 = vmul.f32 %v279_v41, %v277_v35  ;;  %v283_v48 = vmul.f32 %v279_v41, %v278_v36  ;;  %v292_v49 = vmul.f32 %v291_v42, %v1012_v0  ;;  %s1269_s24 = sld [smem:[#allocation2 + $0x94]] }
  0x4e   :  { %v293_v50 = vmul.f32 %v291_v42, %v1017_v1  ;;  %v294_v51 = vmul.f32 %v291_v42, %v1022_v2  ;;  %v295_v52 = vmul.f32 %v291_v42, %v1027_v3  ;;  %v284_v53 = vadd.f32 %v280_v45, %v258_v37 }
  0x4f   :  { %v285_v54 = vadd.f32 %v281_v46, %v259_v38  ;;  %v286_v55 = vadd.f32 %v282_v47, %v260_v39  ;;  %v287_v56 = vadd.f32 %v283_v48, %v261_v40  ;;  %v297_v57 = vadd.f32 %v296_v43, %v292_v49 }
  0x50   :  { %v298_v58 = vadd.f32 %v296_v43, %v293_v50  ;;  %v299_v59 = vadd.f32 %v296_v43, %v294_v51  ;;  %v300_v60 = vadd.f32 %v296_v43, %v295_v52  ;;  %v317_v61 = vstv %s1149_s25  ;;  %s1274_s25 = sld [smem:[#allocation2 + $0x114]] }
  0x51   :  { %v322_v62 = vstv %s1151_s26  ;;  %v331_v63 = vstv %s1153_s27  ;;  %v343_v4 = vstv %s1155_s28  ;;  %v301_v5 = vmax.f32 %v297_v57, 0.0  ;;  %s1277_s26 = sld [smem:[#allocation2 + $0x15]] }
  0x52   :  { %v302_v6 = vmax.f32 %v298_v58, 0.0  ;;  %v303_v7 = vmax.f32 %v299_v59, 0.0  ;;  %v304_v8 = vmax.f32 %v300_v60, 0.0  ;;  %v318_v9 = vmul.f32 %v317_v61, %v1012_v0  ;;  %s1279_s27 = sld [smem:[#allocation2 + $0x95]] }
  0x53   :  { %v319_v10 = vmul.f32 %v317_v61, %v1017_v1  ;;  %v320_v11 = vmul.f32 %v317_v61, %v1022_v2  ;;  %v321_v12 = vmul.f32 %v317_v61, %v1027_v3  ;;  %v306_v13 = vmul.f32 %v305_v44, %v301_v5  ;;  %s1401_s28 = sld [smem:[#allocation2 + $0x1d]] }
  0x54   :  { %v307_v14 = vmul.f32 %v305_v44, %v302_v6  ;;  %v308_v15 = vmul.f32 %v305_v44, %v303_v7  ;;  %v309_v16 = vmul.f32 %v305_v44, %v304_v8  ;;  %v323_v17 = vadd.f32 %v322_v62, %v318_v9 }
  0x55   :  { %v324_v18 = vadd.f32 %v322_v62, %v319_v10  ;;  %v325_v19 = vadd.f32 %v322_v62, %v320_v11  ;;  %v326_v20 = vadd.f32 %v322_v62, %v321_v12  ;;  %v310_v21 = vadd.f32 %v306_v13, %v284_v53 }
  0x56   :  { %v311_v22 = vadd.f32 %v307_v14, %v285_v54  ;;  %v312_v23 = vadd.f32 %v308_v15, %v286_v55  ;;  %v313_v24 = vadd.f32 %v309_v16, %v287_v56  ;;  %v327_v25 = vmax.f32 %v323_v17, 0.0 }
  0x57   :  { %v328_v26 = vmax.f32 %v324_v18, 0.0  ;;  %v329_v27 = vmax.f32 %v325_v19, 0.0  ;;  %v330_v28 = vmax.f32 %v326_v20, 0.0  ;;  %v344_v29 = vmul.f32 %v343_v4, %v1012_v0 }
  0x58   :  { %v345_v30 = vmul.f32 %v343_v4, %v1017_v1  ;;  %v346_v31 = vmul.f32 %v343_v4, %v1022_v2  ;;  %v347_v32 = vmul.f32 %v343_v4, %v1027_v3  ;;  %v332_v33 = vmul.f32 %v331_v63, %v327_v25 }
  0x59   :  { %v333_v34 = vmul.f32 %v331_v63, %v328_v26  ;;  %v334_v35 = vmul.f32 %v331_v63, %v329_v27  ;;  %v335_v36 = vmul.f32 %v331_v63, %v330_v28  ;;  %v348_v37 = vstv %s1165_s29  ;;  %s1403_s29 = sld [smem:[#allocation2 + $0x9d]] }
  0x5a   :  { %v357_v38 = vstv %s1170_s30  ;;  %v369_v39 = vstv %s1173_s3  ;;  %v374_v40 = vstv %s1175_s4  ;;  %v336_v41 = vadd.f32 %v332_v33, %v310_v21  ;;  %s1415_s30 = sld [smem:[#allocation2 + $0x11d]]  ;;  %s1419_s3 = sld [smem:[#allocation2 + $0x1e]] }
  0x5b   :  { %v337_v42 = vadd.f32 %v333_v34, %v311_v22  ;;  %v338_v43 = vadd.f32 %v334_v35, %v312_v23  ;;  %v339_v44 = vadd.f32 %v335_v36, %v313_v24  ;;  %v349_v45 = vadd.f32 %v348_v37, %v344_v29  ;;  %s1421_s4 = sld [smem:[#allocation2 + $0x9e]] }
  0x5c   :  { %v350_v46 = vadd.f32 %v348_v37, %v345_v30  ;;  %v351_v47 = vadd.f32 %v348_v37, %v346_v31  ;;  %v352_v48 = vadd.f32 %v348_v37, %v347_v32  ;;  %v370_v49 = vmul.f32 %v369_v39, %v1012_v0 }
  0x5d   :  { %v371_v50 = vmul.f32 %v369_v39, %v1017_v1  ;;  %v372_v51 = vmul.f32 %v369_v39, %v1022_v2  ;;  %v373_v52 = vmul.f32 %v369_v39, %v1027_v3  ;;  %v353_v53 = vmax.f32 %v349_v45, 0.0 }
  0x5e   :  { %v354_v54 = vmax.f32 %v350_v46, 0.0  ;;  %v355_v55 = vmax.f32 %v351_v47, 0.0  ;;  %v356_v56 = vmax.f32 %v352_v48, 0.0  ;;  %v375_v57 = vadd.f32 %v374_v40, %v370_v49 }
  0x5f   :  { %v376_v58 = vadd.f32 %v374_v40, %v371_v50  ;;  %v377_v59 = vadd.f32 %v374_v40, %v372_v51  ;;  %v378_v60 = vadd.f32 %v374_v40, %v373_v52  ;;  %v358_v61 = vmul.f32 %v357_v38, %v353_v53 }
  0x60   :  { %v359_v62 = vmul.f32 %v357_v38, %v354_v54  ;;  %v360_v63 = vmul.f32 %v357_v38, %v355_v55  ;;  %v361_v4 = vmul.f32 %v357_v38, %v356_v56  ;;  %v379_v5 = vmax.f32 %v375_v57, 0.0 }
  0x61   :  { %v380_v6 = vmax.f32 %v376_v58, 0.0  ;;  %v381_v7 = vmax.f32 %v377_v59, 0.0  ;;  %v382_v8 = vmax.f32 %v378_v60, 0.0  ;;  %v362_v9 = vadd.f32 %v358_v61, %v336_v41 }
  0x62   :  { %v363_v10 = vadd.f32 %v359_v62, %v337_v42  ;;  %v364_v11 = vadd.f32 %v360_v63, %v338_v43  ;;  %v365_v12 = vadd.f32 %v361_v4, %v339_v44  ;;  %v383_v13 = vstv %s1187_s5  ;;  %s1427_s5 = sld [smem:[#allocation2 + $0x11e]] }
  0x63   :  { %v395_v14 = vstv %s1191_s6  ;;  %v400_v15 = vstv %s1193_s7  ;;  %v409_v16 = vstv %s1195_s8  ;;  %v384_v17 = vmul.f32 %v383_v13, %v379_v5  ;;  %s1311_s8 = sld [smem:[#allocation2 + $0x115]]  ;;  %s1429_s6 = sld [smem:[#allocation2 + $0x1f]] }
  0x64   :  { %v385_v18 = vmul.f32 %v383_v13, %v380_v6  ;;  %v386_v19 = vmul.f32 %v383_v13, %v381_v7  ;;  %v387_v20 = vmul.f32 %v383_v13, %v382_v8  ;;  %v396_v21 = vmul.f32 %v395_v14, %v1012_v0  ;;  %s1431_s7 = sld [smem:[#allocation2 + $0x9f]] }
  0x65   :  { %v397_v22 = vmul.f32 %v395_v14, %v1017_v1  ;;  %v398_v23 = vmul.f32 %v395_v14, %v1022_v2  ;;  %v399_v24 = vmul.f32 %v395_v14, %v1027_v3  ;;  %v388_v25 = vadd.f32 %v384_v17, %v362_v9 }
  0x66   :  { %v389_v26 = vadd.f32 %v385_v18, %v363_v10  ;;  %v390_v27 = vadd.f32 %v386_v19, %v364_v11  ;;  %v391_v28 = vadd.f32 %v387_v20, %v365_v12  ;;  %v401_v29 = vadd.f32 %v400_v15, %v396_v21 }
  0x67   :  { %v402_v30 = vadd.f32 %v400_v15, %v397_v22  ;;  %v403_v31 = vadd.f32 %v400_v15, %v398_v23  ;;  %v404_v32 = vadd.f32 %v400_v15, %v399_v24  ;;  %v421_v33 = vstv %s1201_s9  ;;  %s1315_s9 = sld [smem:[#allocation2 + $0x16]] }
  0x68   :  { %v426_v34 = vstv %s1203_s10  ;;  %v435_v35 = vstv %s1205_s11  ;;  %v447_v36 = vstv %s1207_s12  ;;  %v405_v37 = vmax.f32 %v401_v29, 0.0  ;;  %s1319_s10 = sld [smem:[#allocation2 + $0x116]]  ;;  %s1325_s11 = sld [smem:[#allocation2 + $0x17]] }
  0x69   :  { %v406_v38 = vmax.f32 %v402_v30, 0.0  ;;  %v407_v39 = vmax.f32 %v403_v31, 0.0  ;;  %v408_v40 = vmax.f32 %v404_v32, 0.0  ;;  %v422_v41 = vmul.f32 %v421_v33, %v1012_v0  ;;  %s1327_s12 = sld [smem:[#allocation2 + $0x97]] }
  0x6a   :  { %v423_v42 = vmul.f32 %v421_v33, %v1017_v1  ;;  %v424_v43 = vmul.f32 %v421_v33, %v1022_v2  ;;  %v425_v44 = vmul.f32 %v421_v33, %v1027_v3  ;;  %v410_v45 = vmul.f32 %v409_v16, %v405_v37 }
  0x6b   :  { %v411_v46 = vmul.f32 %v409_v16, %v406_v38  ;;  %v412_v47 = vmul.f32 %v409_v16, %v407_v39  ;;  %v413_v48 = vmul.f32 %v409_v16, %v408_v40  ;;  %v427_v49 = vadd.f32 %v426_v34, %v422_v41 }
  0x6c   :  { %v428_v50 = vadd.f32 %v426_v34, %v423_v42  ;;  %v429_v51 = vadd.f32 %v426_v34, %v424_v43  ;;  %v430_v52 = vadd.f32 %v426_v34, %v425_v44  ;;  %v414_v53 = vadd.f32 %v410_v45, %v388_v25 }
  0x6d   :  { %v415_v54 = vadd.f32 %v411_v46, %v389_v26  ;;  %v416_v55 = vadd.f32 %v412_v47, %v390_v27  ;;  %v417_v56 = vadd.f32 %v413_v48, %v391_v28  ;;  %v431_v57 = vmax.f32 %v427_v49, 0.0 }
  0x6e   :  { %v432_v58 = vmax.f32 %v428_v50, 0.0  ;;  %v433_v59 = vmax.f32 %v429_v51, 0.0  ;;  %v434_v60 = vmax.f32 %v430_v52, 0.0  ;;  %v448_v61 = vmul.f32 %v447_v36, %v1012_v0 }
  0x6f   :  { %v449_v62 = vmul.f32 %v447_v36, %v1017_v1  ;;  %v450_v63 = vmul.f32 %v447_v36, %v1022_v2  ;;  %v451_v4 = vmul.f32 %v447_v36, %v1027_v3  ;;  %v436_v5 = vmul.f32 %v435_v35, %v431_v57 }
  0x70   :  { %v437_v6 = vmul.f32 %v435_v35, %v432_v58  ;;  %v438_v7 = vmul.f32 %v435_v35, %v433_v59  ;;  %v439_v8 = vmul.f32 %v435_v35, %v434_v60  ;;  %v452_v9 = vstv %s1217_s13  ;;  %s1329_s13 = sld [smem:[#allocation2 + $0x117]] }
  0x71   :  { %v461_v10 = vstv %s1222_s14  ;;  %v473_v11 = vstv %s1225_s15  ;;  %v478_v12 = vstv %s1227_s16  ;;  %v440_v13 = vadd.f32 %v436_v5, %v414_v53  ;;  %s1331_s14 = sld [smem:[#allocation2 + $0x18]] }
  0x72   :  { %v441_v14 = vadd.f32 %v437_v6, %v415_v54  ;;  %v442_v15 = vadd.f32 %v438_v7, %v416_v55  ;;  %v443_v16 = vadd.f32 %v439_v8, %v417_v56  ;;  %v453_v17 = vadd.f32 %v452_v9, %v448_v61  ;;  %s1341_s15 = sld [smem:[#allocation2 + $0x98]] }
  0x73   :  { %v454_v18 = vadd.f32 %v452_v9, %v449_v62  ;;  %v455_v19 = vadd.f32 %v452_v9, %v450_v63  ;;  %v456_v20 = vadd.f32 %v452_v9, %v451_v4  ;;  %v474_v21 = vmul.f32 %v473_v11, %v1012_v0  ;;  %s1346_s16 = sld [smem:[#allocation2 + $0x118]] }
  0x74   :  { %v475_v22 = vmul.f32 %v473_v11, %v1017_v1  ;;  %v476_v23 = vmul.f32 %v473_v11, %v1022_v2  ;;  %v477_v24 = vmul.f32 %v473_v11, %v1027_v3  ;;  %v457_v25 = vmax.f32 %v453_v17, 0.0 }
  0x75   :  { %v458_v26 = vmax.f32 %v454_v18, 0.0  ;;  %v459_v27 = vmax.f32 %v455_v19, 0.0  ;;  %v460_v28 = vmax.f32 %v456_v20, 0.0  ;;  %v479_v29 = vadd.f32 %v478_v12, %v474_v21 }
  0x76   :  { %v480_v30 = vadd.f32 %v478_v12, %v475_v22  ;;  %v481_v31 = vadd.f32 %v478_v12, %v476_v23  ;;  %v482_v32 = vadd.f32 %v478_v12, %v477_v24  ;;  %v462_v33 = vmul.f32 %v461_v10, %v457_v25 }
  0x77   :  { %v463_v34 = vmul.f32 %v461_v10, %v458_v26  ;;  %v464_v35 = vmul.f32 %v461_v10, %v459_v27  ;;  %v465_v36 = vmul.f32 %v461_v10, %v460_v28  ;;  %v483_v37 = vmax.f32 %v479_v29, 0.0 }
  0x78   :  { %v484_v38 = vmax.f32 %v480_v30, 0.0  ;;  %v485_v39 = vmax.f32 %v481_v31, 0.0  ;;  %v486_v40 = vmax.f32 %v482_v32, 0.0  ;;  %v466_v41 = vadd.f32 %v462_v33, %v440_v13  ;;  %v1294_v31 = vld [vmem:[%s1463_s1 + $0x8] sm:$0xff]  ;;  %v1300_v33 = vld [vmem:[%s1463_s1 + $0x10] sm:$0xff] }
  0x79   :  { %v467_v42 = vadd.f32 %v463_v34, %v441_v14  ;;  %v468_v43 = vadd.f32 %v464_v35, %v442_v15  ;;  %v469_v44 = vadd.f32 %v465_v36, %v443_v16  ;;  %v487_v45 = vstv %s1239_s17  ;;  %v1306_v35 = vld [vmem:[%s1463_s1 + $0x18] sm:$0xff]  ;;  %s1349_s17 = sld [smem:[#allocation2 + $0x19]] }
  0x7a   :  { %v499_v46 = vstv %s1243_s18  ;;  %v504_v47 = vstv %s1245_s19  ;;  %v513_v48 = vstv %s1247_s0  ;;  %v488_v49 = vmul.f32 %v487_v45, %v483_v37  ;;  %s1351_s18 = sld [smem:[#allocation2 + $0x99]]  ;;  %s1367_s0 = sld [smem:[#allocation2 + $0x1a]] }
  0x7b   :  { %v489_v50 = vmul.f32 %v487_v45, %v484_v38  ;;  %v490_v51 = vmul.f32 %v487_v45, %v485_v39  ;;  %v491_v52 = vmul.f32 %v487_v45, %v486_v40  ;;  %v500_v53 = vmul.f32 %v499_v46, %v1012_v0  ;;  %s1363_s19 = sld [smem:[#allocation2 + $0x119]] }
  0x7c   :  { %v501_v54 = vmul.f32 %v499_v46, %v1017_v1  ;;  %v502_v55 = vmul.f32 %v499_v46, %v1022_v2  ;;  %v503_v56 = vmul.f32 %v499_v46, %v1027_v3  ;;  %v492_v57 = vadd.f32 %v488_v49, %v466_v41 }
  0x7d   :  { %v493_v58 = vadd.f32 %v489_v50, %v467_v42  ;;  %v494_v59 = vadd.f32 %v490_v51, %v468_v43  ;;  %v495_v60 = vadd.f32 %v491_v52, %v469_v44  ;;  %v505_v61 = vadd.f32 %v504_v47, %v500_v53 }
  0x7e   :  { %v506_v62 = vadd.f32 %v504_v47, %v501_v54  ;;  %v507_v63 = vadd.f32 %v504_v47, %v502_v55  ;;  %v508_v4 = vadd.f32 %v504_v47, %v503_v56  ;;  %v525_v5 = vstv %s1253_s20  ;;  %s1369_s20 = sld [smem:[#allocation2 + $0x9a]] }
  0x7f   :  { %v530_v6 = vstv %s1255_s21  ;;  %v539_v7 = vstv %s1257_s22  ;;  %v551_v8 = vstv %s1259_s23  ;;  %v509_v9 = vmax.f32 %v505_v61, 0.0  ;;  %s1371_s21 = sld [smem:[#allocation2 + $0x11a]]  ;;  %s1377_s22 = sld [smem:[#allocation2 + $0x1b]] }
  0x80   :  { %v510_v10 = vmax.f32 %v506_v62, 0.0  ;;  %v511_v11 = vmax.f32 %v507_v63, 0.0  ;;  %v512_v12 = vmax.f32 %v508_v4, 0.0  ;;  %v526_v13 = vmul.f32 %v525_v5, %v1012_v0  ;;  %s1379_s23 = sld [smem:[#allocation2 + $0x9b]] }
  0x81   :  { %v527_v14 = vmul.f32 %v525_v5, %v1017_v1  ;;  %v528_v15 = vmul.f32 %v525_v5, %v1022_v2  ;;  %v529_v16 = vmul.f32 %v525_v5, %v1027_v3  ;;  %v514_v17 = vmul.f32 %v513_v48, %v509_v9  ;;  %v1288_v3 = vld [vmem:[%s1463_s1] sm:$0xff]  ;;  %s1317_s1 = sld [smem:[#allocation2 + $0x96]] }
  0x82   :  { %v515_v18 = vmul.f32 %v513_v48, %v510_v10  ;;  %v516_v19 = vmul.f32 %v513_v48, %v511_v11  ;;  %v517_v20 = vmul.f32 %v513_v48, %v512_v12  ;;  %v531_v21 = vadd.f32 %v530_v6, %v526_v13 }
  0x83   :  { %v532_v22 = vadd.f32 %v530_v6, %v527_v14  ;;  %v533_v23 = vadd.f32 %v530_v6, %v528_v15  ;;  %v534_v24 = vadd.f32 %v530_v6, %v529_v16  ;;  %v518_v25 = vadd.f32 %v514_v17, %v492_v57 }
  0x84   :  { %v519_v26 = vadd.f32 %v515_v18, %v493_v58  ;;  %v520_v27 = vadd.f32 %v516_v19, %v494_v59  ;;  %v521_v28 = vadd.f32 %v517_v20, %v495_v60  ;;  %v535_v29 = vmax.f32 %v531_v21, 0.0 }
  0x85   :  { %v536_v0 = vmax.f32 %v532_v22, 0.0  ;;  %v537_v1 = vmax.f32 %v533_v23, 0.0  ;;  %v538_v2 = vmax.f32 %v534_v24, 0.0  ;;  %v552_v30 = vmul.f32 %v1288_v3, %v551_v8 }
  0x86   :  { %v553_v32 = vmul.f32 %v1294_v31, %v551_v8  ;;  %v554_v34 = vmul.f32 %v1300_v33, %v551_v8  ;;  %v555_v36 = vmul.f32 %v1306_v35, %v551_v8  ;;  %v540_v37 = vmul.f32 %v539_v7, %v535_v29 }
  0x87   :  { %v541_v38 = vmul.f32 %v539_v7, %v536_v0  ;;  %v542_v39 = vmul.f32 %v539_v7, %v537_v1  ;;  %v543_v40 = vmul.f32 %v539_v7, %v538_v2  ;;  %v556_v41 = vstv %s1269_s24  ;;  %s1381_s24 = sld [smem:[#allocation2 + $0x11b]] }
  0x88   :  { %v565_v42 = vstv %s1274_s25  ;;  %v577_v43 = vstv %s1277_s26  ;;  %v582_v44 = vstv %s1279_s27  ;;  %v544_v45 = vadd.f32 %v540_v37, %v518_v25  ;;  %s1383_s25 = sld [smem:[#allocation2 + $0x1c]] }
  0x89   :  { %v545_v46 = vadd.f32 %v541_v38, %v519_v26  ;;  %v546_v47 = vadd.f32 %v542_v39, %v520_v27  ;;  %v547_v48 = vadd.f32 %v543_v40, %v521_v28  ;;  %v557_v49 = vadd.f32 %v556_v41, %v552_v30  ;;  %s1393_s26 = sld [smem:[#allocation2 + $0x9c]] }
  0x8a   :  { %v558_v50 = vadd.f32 %v556_v41, %v553_v32  ;;  %v559_v51 = vadd.f32 %v556_v41, %v554_v34  ;;  %v560_v52 = vadd.f32 %v556_v41, %v555_v36  ;;  %v578_v53 = vmul.f32 %v1288_v3, %v577_v43  ;;  %s1398_s27 = sld [smem:[#allocation2 + $0x11c]] }
  0x8b   :  { %v579_v54 = vmul.f32 %v1294_v31, %v577_v43  ;;  %v580_v55 = vmul.f32 %v1300_v33, %v577_v43  ;;  %v581_v56 = vmul.f32 %v1306_v35, %v577_v43  ;;  %v561_v57 = vmax.f32 %v557_v49, 0.0 }
  0x8c   :  { %v562_v58 = vmax.f32 %v558_v50, 0.0  ;;  %v563_v59 = vmax.f32 %v559_v51, 0.0  ;;  %v564_v60 = vmax.f32 %v560_v52, 0.0  ;;  %v583_v61 = vadd.f32 %v582_v44, %v578_v53 }
  0x8d   :  { %v584_v62 = vadd.f32 %v582_v44, %v579_v54  ;;  %v585_v63 = vadd.f32 %v582_v44, %v580_v55  ;;  %v586_v4 = vadd.f32 %v582_v44, %v581_v56  ;;  %v566_v5 = vmul.f32 %v565_v42, %v561_v57 }
  0x8e   :  { %v567_v6 = vmul.f32 %v565_v42, %v562_v58  ;;  %v568_v7 = vmul.f32 %v565_v42, %v563_v59  ;;  %v569_v8 = vmul.f32 %v565_v42, %v564_v60  ;;  %v587_v9 = vmax.f32 %v583_v61, 0.0 }
  0x8f   :  { %v588_v10 = vmax.f32 %v584_v62, 0.0  ;;  %v589_v11 = vmax.f32 %v585_v63, 0.0  ;;  %v590_v12 = vmax.f32 %v586_v4, 0.0  ;;  %v570_v13 = vadd.f32 %v566_v5, %v544_v45 }
  0x90   :  { %v571_v14 = vadd.f32 %v567_v6, %v545_v46  ;;  %v572_v15 = vadd.f32 %v568_v7, %v546_v47  ;;  %v573_v16 = vadd.f32 %v569_v8, %v547_v48  ;;  %v591_v17 = vstv %s1311_s8  ;;  %s1433_s8 = sld [smem:[#allocation2 + $0x11f]] }
  0x91   :  { %v603_v18 = vstv %s1315_s9  ;;  %v608_v19 = vstv %s1317_s1  ;;  %v617_v20 = vstv %s1319_s10  ;;  %v592_v21 = vmul.f32 %v591_v17, %v587_v9  ;;  %s970_s9 = sld [smem:[#allocation2 + $0x180]] }
  0x92   :  { %v593_v22 = vmul.f32 %v591_v17, %v588_v10  ;;  %v594_v23 = vmul.f32 %v591_v17, %v589_v11  ;;  %v595_v24 = vmul.f32 %v591_v17, %v590_v12  ;;  %v604_v25 = vmul.f32 %v1288_v3, %v603_v18 }
  0x93   :  { %v605_v26 = vmul.f32 %v1294_v31, %v603_v18  ;;  %v606_v27 = vmul.f32 %v1300_v33, %v603_v18  ;;  %v607_v28 = vmul.f32 %v1306_v35, %v603_v18  ;;  %v596_v29 = vadd.f32 %v592_v21, %v570_v13 }
  0x94   :  { %v597_v0 = vadd.f32 %v593_v22, %v571_v14  ;;  %v598_v1 = vadd.f32 %v594_v23, %v572_v15  ;;  %v599_v2 = vadd.f32 %v595_v24, %v573_v16  ;;  %v609_v30 = vadd.f32 %v608_v19, %v604_v25 }
  0x95   :  { %v610_v32 = vadd.f32 %v608_v19, %v605_v26  ;;  %v611_v34 = vadd.f32 %v608_v19, %v606_v27  ;;  %v612_v36 = vadd.f32 %v608_v19, %v607_v28  ;;  %v629_v37 = vstv %s1325_s11 }
  0x96   :  { %v634_v38 = vstv %s1327_s12  ;;  %v643_v39 = vstv %s1329_s13  ;;  %v655_v40 = vstv %s1331_s14  ;;  %v613_v41 = vmax.f32 %v609_v30, 0.0 }
  0x97   :  { %v614_v42 = vmax.f32 %v610_v32, 0.0  ;;  %v615_v43 = vmax.f32 %v611_v34, 0.0  ;;  %v616_v44 = vmax.f32 %v612_v36, 0.0  ;;  %v630_v45 = vmul.f32 %v1288_v3, %v629_v37 }
  0x98   :  { %v631_v46 = vmul.f32 %v1294_v31, %v629_v37  ;;  %v632_v47 = vmul.f32 %v1300_v33, %v629_v37  ;;  %v633_v48 = vmul.f32 %v1306_v35, %v629_v37  ;;  %v618_v49 = vmul.f32 %v617_v20, %v613_v41 }
  0x99   :  { %v619_v50 = vmul.f32 %v617_v20, %v614_v42  ;;  %v620_v51 = vmul.f32 %v617_v20, %v615_v43  ;;  %v621_v52 = vmul.f32 %v617_v20, %v616_v44  ;;  %v635_v53 = vadd.f32 %v634_v38, %v630_v45 }
  0x9a   :  { %v636_v54 = vadd.f32 %v634_v38, %v631_v46  ;;  %v637_v55 = vadd.f32 %v634_v38, %v632_v47  ;;  %v638_v56 = vadd.f32 %v634_v38, %v633_v48  ;;  %v622_v57 = vadd.f32 %v618_v49, %v596_v29 }
  0x9b   :  { %v623_v58 = vadd.f32 %v619_v50, %v597_v0  ;;  %v624_v59 = vadd.f32 %v620_v51, %v598_v1  ;;  %v625_v60 = vadd.f32 %v621_v52, %v599_v2  ;;  %v639_v61 = vmax.f32 %v635_v53, 0.0 }
  0x9c   :  { %v640_v62 = vmax.f32 %v636_v54, 0.0  ;;  %v641_v63 = vmax.f32 %v637_v55, 0.0  ;;  %v642_v4 = vmax.f32 %v638_v56, 0.0  ;;  %v656_v5 = vmul.f32 %v1288_v3, %v655_v40 }
  0x9d   :  { %v657_v6 = vmul.f32 %v1294_v31, %v655_v40  ;;  %v658_v7 = vmul.f32 %v1300_v33, %v655_v40  ;;  %v659_v8 = vmul.f32 %v1306_v35, %v655_v40  ;;  %v644_v9 = vmul.f32 %v643_v39, %v639_v61 }
  0x9e   :  { %v645_v10 = vmul.f32 %v643_v39, %v640_v62  ;;  %v646_v11 = vmul.f32 %v643_v39, %v641_v63  ;;  %v647_v12 = vmul.f32 %v643_v39, %v642_v4  ;;  %v660_v13 = vstv %s1341_s15 }
  0x9f   :  { %v669_v14 = vstv %s1346_s16  ;;  %v681_v15 = vstv %s1349_s17  ;;  %v686_v16 = vstv %s1351_s18  ;;  %v648_v17 = vadd.f32 %v644_v9, %v622_v57 }
  0xa0   :  { %v649_v18 = vadd.f32 %v645_v10, %v623_v58  ;;  %v650_v19 = vadd.f32 %v646_v11, %v624_v59  ;;  %v651_v20 = vadd.f32 %v647_v12, %v625_v60  ;;  %v661_v21 = vadd.f32 %v660_v13, %v656_v5 }
  0xa1   :  { %v662_v22 = vadd.f32 %v660_v13, %v657_v6  ;;  %v663_v23 = vadd.f32 %v660_v13, %v658_v7  ;;  %v664_v24 = vadd.f32 %v660_v13, %v659_v8  ;;  %v682_v25 = vmul.f32 %v1288_v3, %v681_v15 }
  0xa2   :  { %v683_v26 = vmul.f32 %v1294_v31, %v681_v15  ;;  %v684_v27 = vmul.f32 %v1300_v33, %v681_v15  ;;  %v685_v28 = vmul.f32 %v1306_v35, %v681_v15  ;;  %v665_v29 = vmax.f32 %v661_v21, 0.0 }
  0xa3   :  { %v666_v0 = vmax.f32 %v662_v22, 0.0  ;;  %v667_v1 = vmax.f32 %v663_v23, 0.0  ;;  %v668_v2 = vmax.f32 %v664_v24, 0.0  ;;  %v687_v30 = vadd.f32 %v686_v16, %v682_v25 }
  0xa4   :  { %v688_v32 = vadd.f32 %v686_v16, %v683_v26  ;;  %v689_v34 = vadd.f32 %v686_v16, %v684_v27  ;;  %v690_v36 = vadd.f32 %v686_v16, %v685_v28  ;;  %v670_v37 = vmul.f32 %v669_v14, %v665_v29 }
  0xa5   :  { %v671_v38 = vmul.f32 %v669_v14, %v666_v0  ;;  %v672_v39 = vmul.f32 %v669_v14, %v667_v1  ;;  %v673_v40 = vmul.f32 %v669_v14, %v668_v2  ;;  %v691_v41 = vmax.f32 %v687_v30, 0.0 }
  0xa6   :  { %v692_v42 = vmax.f32 %v688_v32, 0.0  ;;  %v693_v43 = vmax.f32 %v689_v34, 0.0  ;;  %v694_v44 = vmax.f32 %v690_v36, 0.0  ;;  %v674_v45 = vadd.f32 %v670_v37, %v648_v17 }
  0xa7   :  { %v675_v46 = vadd.f32 %v671_v38, %v649_v18  ;;  %v676_v47 = vadd.f32 %v672_v39, %v650_v19  ;;  %v677_v48 = vadd.f32 %v673_v40, %v651_v20  ;;  %v695_v49 = vstv %s1363_s19 }
  0xa8   :  { %v707_v50 = vstv %s1367_s0  ;;  %v712_v51 = vstv %s1369_s20  ;;  %v721_v52 = vstv %s1371_s21  ;;  %v696_v53 = vmul.f32 %v695_v49, %v691_v41 }
  0xa9   :  { %v697_v54 = vmul.f32 %v695_v49, %v692_v42  ;;  %v698_v55 = vmul.f32 %v695_v49, %v693_v43  ;;  %v699_v56 = vmul.f32 %v695_v49, %v694_v44  ;;  %v708_v57 = vmul.f32 %v1288_v3, %v707_v50 }
  0xaa   :  { %v709_v58 = vmul.f32 %v1294_v31, %v707_v50  ;;  %v710_v59 = vmul.f32 %v1300_v33, %v707_v50  ;;  %v711_v60 = vmul.f32 %v1306_v35, %v707_v50  ;;  %v700_v61 = vadd.f32 %v696_v53, %v674_v45 }
  0xab   :  { %v701_v62 = vadd.f32 %v697_v54, %v675_v46  ;;  %v702_v63 = vadd.f32 %v698_v55, %v676_v47  ;;  %v703_v4 = vadd.f32 %v699_v56, %v677_v48  ;;  %v713_v5 = vadd.f32 %v712_v51, %v708_v57 }
  0xac   :  { %v714_v6 = vadd.f32 %v712_v51, %v709_v58  ;;  %v715_v7 = vadd.f32 %v712_v51, %v710_v59  ;;  %v716_v8 = vadd.f32 %v712_v51, %v711_v60  ;;  %v733_v9 = vstv %s1377_s22 }
  0xad   :  { %v738_v10 = vstv %s1379_s23  ;;  %v747_v11 = vstv %s1381_s24  ;;  %v759_v12 = vstv %s1383_s25  ;;  %v717_v13 = vmax.f32 %v713_v5, 0.0 }
  0xae   :  { %v718_v14 = vmax.f32 %v714_v6, 0.0  ;;  %v719_v15 = vmax.f32 %v715_v7, 0.0  ;;  %v720_v16 = vmax.f32 %v716_v8, 0.0  ;;  %v734_v17 = vmul.f32 %v1288_v3, %v733_v9 }
  0xaf   :  { %v735_v18 = vmul.f32 %v1294_v31, %v733_v9  ;;  %v736_v19 = vmul.f32 %v1300_v33, %v733_v9  ;;  %v737_v20 = vmul.f32 %v1306_v35, %v733_v9  ;;  %v722_v21 = vmul.f32 %v721_v52, %v717_v13 }
  0xb0   :  { %v723_v22 = vmul.f32 %v721_v52, %v718_v14  ;;  %v724_v23 = vmul.f32 %v721_v52, %v719_v15  ;;  %v725_v24 = vmul.f32 %v721_v52, %v720_v16  ;;  %v739_v25 = vadd.f32 %v738_v10, %v734_v17 }
  0xb1   :  { %v740_v26 = vadd.f32 %v738_v10, %v735_v18  ;;  %v741_v27 = vadd.f32 %v738_v10, %v736_v19  ;;  %v742_v28 = vadd.f32 %v738_v10, %v737_v20  ;;  %v726_v29 = vadd.f32 %v722_v21, %v700_v61 }
  0xb2   :  { %v727_v0 = vadd.f32 %v723_v22, %v701_v62  ;;  %v728_v1 = vadd.f32 %v724_v23, %v702_v63  ;;  %v729_v2 = vadd.f32 %v725_v24, %v703_v4  ;;  %v743_v30 = vmax.f32 %v739_v25, 0.0 }
  0xb3   :  { %v744_v32 = vmax.f32 %v740_v26, 0.0  ;;  %v745_v34 = vmax.f32 %v741_v27, 0.0  ;;  %v746_v36 = vmax.f32 %v742_v28, 0.0  ;;  %v760_v37 = vmul.f32 %v1288_v3, %v759_v12 }
  0xb4   :  { %v761_v38 = vmul.f32 %v1294_v31, %v759_v12  ;;  %v762_v39 = vmul.f32 %v1300_v33, %v759_v12  ;;  %v763_v40 = vmul.f32 %v1306_v35, %v759_v12  ;;  %v748_v41 = vmul.f32 %v747_v11, %v743_v30 }
  0xb5   :  { %v749_v42 = vmul.f32 %v747_v11, %v744_v32  ;;  %v750_v43 = vmul.f32 %v747_v11, %v745_v34  ;;  %v751_v44 = vmul.f32 %v747_v11, %v746_v36  ;;  %v764_v45 = vstv %s1393_s26 }
  0xb6   :  { %v773_v46 = vstv %s1398_s27  ;;  %v785_v47 = vstv %s1401_s28  ;;  %v790_v48 = vstv %s1403_s29  ;;  %v752_v49 = vadd.f32 %v748_v41, %v726_v29 }
  0xb7   :  { %v753_v50 = vadd.f32 %v749_v42, %v727_v0  ;;  %v754_v51 = vadd.f32 %v750_v43, %v728_v1  ;;  %v755_v52 = vadd.f32 %v751_v44, %v729_v2  ;;  %v765_v53 = vadd.f32 %v764_v45, %v760_v37 }
  0xb8   :  { %v766_v54 = vadd.f32 %v764_v45, %v761_v38  ;;  %v767_v55 = vadd.f32 %v764_v45, %v762_v39  ;;  %v768_v56 = vadd.f32 %v764_v45, %v763_v40  ;;  %v786_v57 = vmul.f32 %v1288_v3, %v785_v47 }
  0xb9   :  { %v787_v58 = vmul.f32 %v1294_v31, %v785_v47  ;;  %v788_v59 = vmul.f32 %v1300_v33, %v785_v47  ;;  %v789_v60 = vmul.f32 %v1306_v35, %v785_v47  ;;  %v769_v61 = vmax.f32 %v765_v53, 0.0 }
  0xba   :  { %v770_v62 = vmax.f32 %v766_v54, 0.0  ;;  %v771_v63 = vmax.f32 %v767_v55, 0.0  ;;  %v772_v4 = vmax.f32 %v768_v56, 0.0  ;;  %v791_v5 = vadd.f32 %v790_v48, %v786_v57 }
  0xbb   :  { %v792_v6 = vadd.f32 %v790_v48, %v787_v58  ;;  %v793_v7 = vadd.f32 %v790_v48, %v788_v59  ;;  %v794_v8 = vadd.f32 %v790_v48, %v789_v60  ;;  %v774_v9 = vmul.f32 %v773_v46, %v769_v61 }
  0xbc   :  { %v775_v10 = vmul.f32 %v773_v46, %v770_v62  ;;  %v776_v11 = vmul.f32 %v773_v46, %v771_v63  ;;  %v777_v12 = vmul.f32 %v773_v46, %v772_v4  ;;  %v795_v13 = vmax.f32 %v791_v5, 0.0 }
  0xbd   :  { %v796_v14 = vmax.f32 %v792_v6, 0.0  ;;  %v797_v15 = vmax.f32 %v793_v7, 0.0  ;;  %v798_v16 = vmax.f32 %v794_v8, 0.0  ;;  %v778_v17 = vadd.f32 %v774_v9, %v752_v49 }
  0xbe   :  { %v779_v18 = vadd.f32 %v775_v10, %v753_v50  ;;  %v780_v19 = vadd.f32 %v776_v11, %v754_v51  ;;  %v781_v20 = vadd.f32 %v777_v12, %v755_v52  ;;  %v799_v21 = vstv %s1415_s30 }
  0xbf   :  { %v811_v22 = vstv %s1419_s3  ;;  %v816_v23 = vstv %s1421_s4  ;;  %v800_v24 = vmul.f32 %v799_v21, %v795_v13  ;;  %v801_v25 = vmul.f32 %v799_v21, %v796_v14 }
  0xc0   :  { %v802_v26 = vmul.f32 %v799_v21, %v797_v15  ;;  %v803_v27 = vmul.f32 %v799_v21, %v798_v16  ;;  %v812_v28 = vmul.f32 %v1288_v3, %v811_v22  ;;  %v813_v29 = vmul.f32 %v1294_v31, %v811_v22 }
  0xc1   :  { %v814_v0 = vmul.f32 %v1300_v33, %v811_v22  ;;  %v815_v1 = vmul.f32 %v1306_v35, %v811_v22  ;;  %v804_v2 = vadd.f32 %v800_v24, %v778_v17  ;;  %v805_v30 = vadd.f32 %v801_v25, %v779_v18 }
  0xc2   :  { %v806_v32 = vadd.f32 %v802_v26, %v780_v19  ;;  %v825_v34 = vstv %s1427_s5  ;;  %v817_v36 = vadd.f32 %v816_v23, %v812_v28  ;;  %v818_v37 = vadd.f32 %v816_v23, %v813_v29 }
  0xc3   :  { %v819_v38 = vadd.f32 %v816_v23, %v814_v0  ;;  %v820_v39 = vadd.f32 %v816_v23, %v815_v1  ;;  %v807_v40 = vadd.f32 %v803_v27, %v781_v20  ;;  %v837_v41 = vstv %s1429_s6 }
  0xc4   :  { %v842_v42 = vstv %s1431_s7  ;;  %v851_v43 = vstv %s1433_s8  ;;  %v821_v44 = vmax.f32 %v817_v36, 0.0  ;;  %v822_v45 = vmax.f32 %v818_v37, 0.0 }
  0xc5   :  { %v823_v46 = vmax.f32 %v819_v38, 0.0  ;;  %v824_v47 = vmax.f32 %v820_v39, 0.0  ;;  %v838_v48 = vmul.f32 %v1288_v3, %v837_v41  ;;  %v839_v49 = vmul.f32 %v1294_v31, %v837_v41 }
  0xc6   :  { %v840_v50 = vmul.f32 %v1300_v33, %v837_v41  ;;  %v841_v51 = vmul.f32 %v1306_v35, %v837_v41  ;;  %v826_v52 = vmul.f32 %v825_v34, %v821_v44  ;;  %v827_v53 = vmul.f32 %v825_v34, %v822_v45 }
  0xc7   :  { %v828_v54 = vmul.f32 %v825_v34, %v823_v46  ;;  %v829_v55 = vmul.f32 %v825_v34, %v824_v47  ;;  %v843_v56 = vadd.f32 %v842_v42, %v838_v48  ;;  %v844_v57 = vadd.f32 %v842_v42, %v839_v49 }
  0xc8   :  { %v845_v58 = vadd.f32 %v842_v42, %v840_v50  ;;  %v846_v59 = vadd.f32 %v842_v42, %v841_v51  ;;  %v830_v60 = vadd.f32 %v826_v52, %v804_v2  ;;  %v831_v61 = vadd.f32 %v827_v53, %v805_v30 }
  0xc9   :  { %v832_v62 = vadd.f32 %v828_v54, %v806_v32  ;;  %v833_v63 = vadd.f32 %v829_v55, %v807_v40  ;;  %v847_v4 = vmax.f32 %v843_v56, 0.0  ;;  %v848_v3 = vmax.f32 %v844_v57, 0.0 }
  0xca   :  { %v849_v5 = vmax.f32 %v845_v58, 0.0  ;;  %v850_v31 = vmax.f32 %v846_v59, 0.0  ;;  %v861_v8 = vstv %s970_s9 }
  0xcb   :  { %v852_v6 = vmul.f32 %v851_v43, %v847_v4  ;;  %v853_v33 = vmul.f32 %v851_v43, %v848_v3 }
  0xcc   :  { %v854_v7 = vmul.f32 %v851_v43, %v849_v5  ;;  %v855_v35 = vmul.f32 %v851_v43, %v850_v31 }
  0xcd   :  { %v856_v9 = vadd.f32 %v852_v6, %v830_v60  ;;  %v857_v10 = vadd.f32 %v853_v33, %v831_v61 }
  0xce   :  { %v858_v11 = vadd.f32 %v854_v7, %v832_v62  ;;  %v859_v12 = vadd.f32 %v855_v35, %v833_v63 }
  0xcf   :  { %v862_v13 = vadd.f32 %v861_v8, %v856_v9  ;;  %v863_v14 = vadd.f32 %v861_v8, %v857_v10 }
  0xd0   :  { %v864_v15 = vadd.f32 %v861_v8, %v858_v11  ;;  %v865_v16 = vadd.f32 %v861_v8, %v859_v12 }
  0xd1   :  { %866 = vst [vmem:[%s1464_s2] sm:$0xff] %v862_v13  ;;  %867 = vst [vmem:[%s1464_s2 + $0x8] sm:$0xff] %v863_v14 }
  0xd2   :  { %868 = vst [vmem:[%s1464_s2 + $0x10] sm:$0xff] %v864_v15  ;;  %869 = vst [vmem:[%s1464_s2 + $0x18] sm:$0xff] %v865_v16 }
  0xd3   :  { %874 = vsyncpa [#allocation3], 1 }

</bundles_post_ra>
